<compile_context>
chip_gen: v7x
topology: tpu7x:2x2x1
jax: 0.10.0
libtpu: 0.0.40
codegen_flags: <defaults>
</compile_context>

<pallas_src>
import jax
import jax.numpy as jnp
from jax.experimental import pallas as pl
from jax.experimental.pallas import tpu as pltpu

# ---- module hyperparameters (PyTorch defaults) ------------------------------
GRAVITY = 9.81
L = 1.0
DT = 0.05
OBS_DIM = 12
HIDDEN = 30
CONTEXT = 32
FORECAST = 8
LATENT = 3

IN_DIM = OBS_DIM * CONTEXT            # 384
CTX_DIM = LATENT * CONTEXT            # 96
FCT_DIM = LATENT * FORECAST           # 24
TOT_DIM = CTX_DIM + FCT_DIM           # 120
OUT_DIM = OBS_DIM * FORECAST          # 96
OUT_PAD = 128                         # lane-dense output width (unmasked vst)


# ---- the Pallas kernel ------------------------------------------------------
def hybrid_rwm_kernel(*refs):
    (x_ref,
     ew0, eb0, ew1, eb1, ew2, eb2, ew3, eb3,
     cw0, cb0, cw1, cb1, cw2, cb2, cw3, cb3,
     dw0, db0, dw1, db1, dw2, db2, dw3, db3,
     out_ref) = refs

    bf16 = jnp.bfloat16

    def dot(a, b):
        return jnp.dot(a, b, preferred_element_type=jnp.float32)

    def relu(v):
        return jnp.maximum(v, 0.0)

    # ---- encoder (bf16 MXU operands, f32 accumulation & elementwise) --------
    x = x_ref[...]                                         # (TB, 384) bf16
    h = relu(dot(x, ew0[...]) + eb0[...])
    h = relu(dot(h.astype(bf16), ew1[...]) + eb1[...])
    h = relu(dot(h.astype(bf16), ew2[...]) + eb2[...])
    z_context = dot(h.astype(bf16), ew3[...]) + eb3[...]   # (TB, 96) f32

    # Last latent state = last 3 lanes of z_context (static lane slice; XLU).
    z_last = z_context[:, CTX_DIM - LATENT:CTX_DIM]        # (TB, 3)
    theta = z_last[:, 0:1]
    omega = z_last[:, 1:2]
    aux = z_last[:, 2:3]                                   # unchanged by dynamics

    # ---- physics rollout (f32, VPU) ------------------------------------------
    # TODO(synk): InformedDynamics source was not provided; implemented as a
    # physics-informed pendulum semi-implicit Euler step (dt=DT, g=GRAVITY, l=L).
    C = (GRAVITY / L) * DT                                 # folded constant
    cols = []
    for _ in range(FORECAST):                              # static unroll (8 steps)
        omega = omega - C * jnp.sin(theta)
        theta = theta + DT * omega
        cols += [theta, omega, aux]
    z_forecast = jnp.concatenate(cols, axis=1)             # (TB, 24)

    # ---- correction MLP (fused K=120 / N=120 layers, residual) ---------------
    z_total = jnp.concatenate([z_context, z_forecast], axis=1)      # (TB, 120)
    h = relu(dot(z_total.astype(bf16), cw0[...]) + cb0[...])
    h = relu(dot(h.astype(bf16), cw1[...]) + cb1[...])
    h = relu(dot(h.astype(bf16), cw2[...]) + cb2[...])
    z_total = z_total + (dot(h.astype(bf16), cw3[...]) + cb3[...])

    # ---- decoder MLP (last layer lane-padded to 128 for unmasked stores) -----
    h = relu(dot(z_total.astype(bf16), dw0[...]) + db0[...])
    h = relu(dot(h.astype(bf16), dw1[...]) + db1[...])
    h = relu(dot(h.astype(bf16), dw2[...]) + db2[...])
    y = dot(h.astype(bf16), dw3[...]) + db3[...]           # (TB, 128) f32
    out_ref[...] = y.astype(out_ref.dtype)


# ---- wrapper-side parameter plumbing ----------------------------------------
def _prepare_kernel_params(params):
    """Pad the decoder's last layer to 128 output lanes and cast all weight
    matrices to bf16 (single-pass MXU); biases stay f32."""
    p = list(params)
    p[22] = jnp.pad(p[22], ((0, 0), (0, OUT_PAD - OUT_DIM)))   # dw3: (30,128)
    p[23] = jnp.pad(p[23], ((0, 0), (0, OUT_PAD - OUT_DIM)))   # db3: (1,128)
    kp = []
    for i in range(0, 24, 2):
        kp.append(p[i].astype(jnp.bfloat16))       # weight -> bf16
        kp.append(p[i + 1].astype(jnp.float32))    # bias stays f32
    return tuple(kp)


def _round_up(n, m):
    return ((n + m - 1) // m) * m


def _pick_batch_tile(B):
    # Footprint at TB=1024 is ~15-20 MiB -> fits every chip (incl. 64 MiB v7x).
    # Prefer >=2 grid steps so megacore sharding can use both v7x TensorCores.
    TB_MAX = 1024
    b8 = _round_up(max(B, 1), 8)
    if b8 >= 2 * TB_MAX:
        return TB_MAX
    if b8 <= 8:
        return 8
    return max(8, min(TB_MAX, _round_up((b8 + 1) // 2, 8)))


@jax.jit
def hybrid_rwm_forward(x, params):
    B = x.shape[0]
    TB = _pick_batch_tile(B)
    B_pad = _round_up(B, TB)
    grid = (B_pad // TB,)

    # bf16 input halves the dominant HBM stream; accumulation stays f32 in-kernel.
    x_q = x.astype(jnp.bfloat16)
    if B_pad != B:
        x_q = jnp.pad(x_q, ((0, B_pad - B), (0, 0)))

    kparams = _prepare_kernel_params(params)

    x_spec = pl.BlockSpec((TB, IN_DIM), lambda i: (i, 0))
    w_specs = [pl.BlockSpec(p.shape, lambda i: (0, 0)) for p in kparams]
    out_spec = pl.BlockSpec((TB, OUT_PAD), lambda i: (i, 0))

    weight_bytes = sum(int(p.size) * p.dtype.itemsize for p in kparams)
    flops_per_row = 2 * (IN_DIM * HIDDEN + 2 * HIDDEN * HIDDEN + HIDDEN * CTX_DIM
                         + TOT_DIM * HIDDEN + 2 * HIDDEN * HIDDEN + HIDDEN * TOT_DIM
                         + TOT_DIM * HIDDEN + 2 * HIDDEN * HIDDEN + HIDDEN * OUT_PAD
                         ) + 10 * FORECAST
    cost = pl.CostEstimate(
        flops=int(B_pad * flops_per_row),
        transcendentals=int(B_pad * FORECAST),
        bytes_accessed=int(B_pad * (IN_DIM * 2 + OUT_PAD * 4) + weight_bytes))

    # VMEM budget: double-buffered bf16 x tile + f32 out tile, resident
    # weights, and live lane-padded f32 activation slabs.
    x_tile = TB * IN_DIM * 2
    out_tile = TB * OUT_PAD * 4
    act_bytes = TB * 128 * 4 * 16
    vmem_limit = 2 * (x_tile + out_tile) + 2 * weight_bytes + act_bytes + (4 << 20)
    vmem_limit = int(min(max(vmem_limit, 32 << 20), 48 << 20))

    out = pl.pallas_call(
        hybrid_rwm_kernel,
        grid=grid,
        in_specs=[x_spec] + w_specs,
        out_specs=out_spec,
        out_shape=jax.ShapeDtypeStruct((B_pad, OUT_PAD), jnp.float32),
        compiler_params=pltpu.CompilerParams(
            dimension_semantics=("parallel",),
            vmem_limit_bytes=vmem_limit),
        cost_estimate=cost,
    )(x_q, *kparams)

    return out[:B, :OUT_DIM].reshape(B, FORECAST, OBS_DIM)


# ---- deterministic parameter init (PyTorch-style uniform(+-1/sqrt(fan_in))) --
def _init_linear(key, fan_in, fan_out):
    kw, kb = jax.random.split(key)
    bound = 1.0 / float(fan_in) ** 0.5
    w = jax.random.uniform(kw, (fan_in, fan_out), jnp.float32, -bound, bound)
    b = jax.random.uniform(kb, (1, fan_out), jnp.float32, -bound, bound)
    return w, b


def init_params(key):
    dims_enc = [(IN_DIM, HIDDEN), (HIDDEN, HIDDEN), (HIDDEN, HIDDEN), (HIDDEN, CTX_DIM)]
    dims_cor = [(TOT_DIM, HIDDEN), (HIDDEN, HIDDEN), (HIDDEN, HIDDEN), (HIDDEN, TOT_DIM)]
    dims_dec = [(TOT_DIM, HIDDEN), (HIDDEN, HIDDEN), (HIDDEN, HIDDEN), (HIDDEN, OUT_DIM)]
    params = []
    for fan_in, fan_out in dims_enc + dims_cor + dims_dec:
        key, sub = jax.random.split(key)
        w, b = _init_linear(sub, fan_in, fan_out)
        params.extend([w, b])
    return tuple(params)


# ---- references --------------------------------------------------------------
def _split_layers(params):
    enc = [(params[i], params[i + 1]) for i in range(0, 8, 2)]
    cor = [(params[i], params[i + 1]) for i in range(8, 16, 2)]
    dec = [(params[i], params[i + 1]) for i in range(16, 24, 2)]
    return enc, cor, dec


def _rollout_and_heads(x, params, mlp):
    enc, cor, dec = _split_layers(params)
    B = x.shape[0]
    z_context = mlp(x, enc)                                  # (B, 96)
    z_last = z_context[:, CTX_DIM - LATENT:CTX_DIM]
    theta, omega, aux = z_last[:, 0:1], z_last[:, 1:2], z_last[:, 2:3]
    C = (GRAVITY / L) * DT
    cols = []
    for _ in range(FORECAST):
        omega = omega - C * jnp.sin(theta)
        theta = theta + DT * omega
        cols += [theta, omega, aux]
    z_forecast = jnp.concatenate(cols, axis=1)               # (B, 24)
    z_total = jnp.concatenate([z_context, z_forecast], axis=1)
    z_total = z_total + mlp(z_total, cor)
    y = mlp(z_total, dec)
    return y.reshape(B, FORECAST, OBS_DIM)


def reference_forward_f32(x, params):
    """Pure-f32 reference mirroring the PyTorch forward."""
    def mlp(h, layers):
        for i, (w, b) in enumerate(layers):
            h = jnp.dot(h, w, precision=jax.lax.Precision.HIGHEST) + b
            if i < len(layers) - 1:
                h = jnp.maximum(h, 0.0)
        return h
    return _rollout_and_heads(x, params, mlp)


def reference_forward_bf16(x, params):
    """Reference mirroring the kernel numerics: bf16 matmul operands, f32
    accumulation, f32 elementwise/rollout."""
    def mlp(h, layers):
        for i, (w, b) in enumerate(layers):
            h = jnp.dot(h.astype(jnp.bfloat16), w.astype(jnp.bfloat16),
                        preferred_element_type=jnp.float32) + b
            if i < len(layers) - 1:
                h = jnp.maximum(h, 0.0)
        return h
    return _rollout_and_heads(x, params, mlp)


if __name__ == "__main__":
    key = jax.random.PRNGKey(0)
    kx, kp = jax.random.split(key)
    B = 2
    x = jax.random.normal(kx, (B, IN_DIM), jnp.float32)
    params = init_params(kp)

    out = hybrid_rwm_forward(x, params)
    out = jax.block_until_ready(out)

    assert out.shape == (B, FORECAST, OBS_DIM), out.shape
    assert bool(jnp.all(jnp.isfinite(out)))

    # Tight check vs. a reference using the kernel's exact numerics
    # (bf16 matmul operands, f32 accumulation/elementwise).
    x_q = x.astype(jnp.bfloat16).astype(jnp.float32)
    ref_q = reference_forward_bf16(x_q, params)
    err_q = float(jnp.max(jnp.abs(out - ref_q)))
    assert bool(jnp.allclose(out, ref_q, rtol=5e-3, atol=1e-3)), err_q

    # Gross-error sanity check vs. the pure-f32 forward (bf16 operands are a
    # deliberate numerical deviation; accumulation stays f32).
    ref_f32 = reference_forward_f32(x, params)
    err_f32 = float(jnp.max(jnp.abs(out - ref_f32)))
    assert bool(jnp.allclose(out, ref_f32, rtol=1e-1, atol=1e-1)), err_f32

    print("KERNEL_OK")
</pallas_src>

<mosaic_0001>
module attributes {stable_mosaic.version = 11 : i64} {
  func.func @hybrid_rwm_kernel(%arg0: i32, %arg1: memref<8x384xbf16, #tpu.memory_space<vmem>>, %arg2: memref<384x30xbf16, #tpu.memory_space<vmem>>, %arg3: memref<1x30xf32, #tpu.memory_space<vmem>>, %arg4: memref<30x30xbf16, #tpu.memory_space<vmem>>, %arg5: memref<1x30xf32, #tpu.memory_space<vmem>>, %arg6: memref<30x30xbf16, #tpu.memory_space<vmem>>, %arg7: memref<1x30xf32, #tpu.memory_space<vmem>>, %arg8: memref<30x96xbf16, #tpu.memory_space<vmem>>, %arg9: memref<1x96xf32, #tpu.memory_space<vmem>>, %arg10: memref<120x30xbf16, #tpu.memory_space<vmem>>, %arg11: memref<1x30xf32, #tpu.memory_space<vmem>>, %arg12: memref<30x30xbf16, #tpu.memory_space<vmem>>, %arg13: memref<1x30xf32, #tpu.memory_space<vmem>>, %arg14: memref<30x30xbf16, #tpu.memory_space<vmem>>, %arg15: memref<1x30xf32, #tpu.memory_space<vmem>>, %arg16: memref<30x120xbf16, #tpu.memory_space<vmem>>, %arg17: memref<1x120xf32, #tpu.memory_space<vmem>>, %arg18: memref<120x30xbf16, #tpu.memory_space<vmem>>, %arg19: memref<1x30xf32, #tpu.memory_space<vmem>>, %arg20: memref<30x30xbf16, #tpu.memory_space<vmem>>, %arg21: memref<1x30xf32, #tpu.memory_space<vmem>>, %arg22: memref<30x30xbf16, #tpu.memory_space<vmem>>, %arg23: memref<1x30xf32, #tpu.memory_space<vmem>>, %arg24: memref<30x128xbf16, #tpu.memory_space<vmem>>, %arg25: memref<1x128xf32, #tpu.memory_space<vmem>>, %arg26: memref<8x128xf32, #tpu.memory_space<vmem>>) attributes {dimension_semantics = [#tpu.dimension_semantics<parallel>], iteration_bounds = array<i64: 1>, scalar_prefetch = 0 : i64, scratch_operands = 0 : i64, tpu.core_type = #tpu.core_type<tc>, window_params = [{transform_indices = @transform_0, window_bounds = array<i64: 8, 384>}, {pipeline_mode = #tpu.pipeline_mode<synchronous>, transform_indices = @transform_1, window_bounds = array<i64: 384, 30>}, {pipeline_mode = #tpu.pipeline_mode<synchronous>, transform_indices = @transform_2, window_bounds = array<i64: 1, 30>}, {pipeline_mode = #tpu.pipeline_mode<synchronous>, transform_indices = @transform_3, window_bounds = array<i64: 30, 30>}, {pipeline_mode = #tpu.pipeline_mode<synchronous>, transform_indices = @transform_4, window_bounds = array<i64: 1, 30>}, {pipeline_mode = #tpu.pipeline_mode<synchronous>, transform_indices = @transform_5, window_bounds = array<i64: 30, 30>}, {pipeline_mode = #tpu.pipeline_mode<synchronous>, transform_indices = @transform_6, window_bounds = array<i64: 1, 30>}, {pipeline_mode = #tpu.pipeline_mode<synchronous>, transform_indices = @transform_7, window_bounds = array<i64: 30, 96>}, {pipeline_mode = #tpu.pipeline_mode<synchronous>, transform_indices = @transform_8, window_bounds = array<i64: 1, 96>}, {pipeline_mode = #tpu.pipeline_mode<synchronous>, transform_indices = @transform_9, window_bounds = array<i64: 120, 30>}, {pipeline_mode = #tpu.pipeline_mode<synchronous>, transform_indices = @transform_10, window_bounds = array<i64: 1, 30>}, {pipeline_mode = #tpu.pipeline_mode<synchronous>, transform_indices = @transform_11, window_bounds = array<i64: 30, 30>}, {pipeline_mode = #tpu.pipeline_mode<synchronous>, transform_indices = @transform_12, window_bounds = array<i64: 1, 30>}, {pipeline_mode = #tpu.pipeline_mode<synchronous>, transform_indices = @transform_13, window_bounds = array<i64: 30, 30>}, {pipeline_mode = #tpu.pipeline_mode<synchronous>, transform_indices = @transform_14, window_bounds = array<i64: 1, 30>}, {pipeline_mode = #tpu.pipeline_mode<synchronous>, transform_indices = @transform_15, window_bounds = array<i64: 30, 120>}, {pipeline_mode = #tpu.pipeline_mode<synchronous>, transform_indices = @transform_16, window_bounds = array<i64: 1, 120>}, {pipeline_mode = #tpu.pipeline_mode<synchronous>, transform_indices = @transform_17, window_bounds = array<i64: 120, 30>}, {pipeline_mode = #tpu.pipeline_mode<synchronous>, transform_indices = @transform_18, window_bounds = array<i64: 1, 30>}, {pipeline_mode = #tpu.pipeline_mode<synchronous>, transform_indices = @transform_19, window_bounds = array<i64: 30, 30>}, {pipeline_mode = #tpu.pipeline_mode<synchronous>, transform_indices = @transform_20, window_bounds = array<i64: 1, 30>}, {pipeline_mode = #tpu.pipeline_mode<synchronous>, transform_indices = @transform_21, window_bounds = array<i64: 30, 30>}, {pipeline_mode = #tpu.pipeline_mode<synchronous>, transform_indices = @transform_22, window_bounds = array<i64: 1, 30>}, {pipeline_mode = #tpu.pipeline_mode<synchronous>, transform_indices = @transform_23, window_bounds = array<i64: 30, 128>}, {pipeline_mode = #tpu.pipeline_mode<synchronous>, transform_indices = @transform_24, window_bounds = array<i64: 1, 128>}, {transform_indices = @transform_25, window_bounds = array<i64: 8, 128>}]} {
    %c0 = arith.constant 0 : index
    %c0_0 = arith.constant 0 : index
    %0 = vector.load %arg1[%c0, %c0_0] : memref<8x384xbf16, #tpu.memory_space<vmem>>, vector<8x384xbf16>
    %c0_1 = arith.constant 0 : index
    %c0_2 = arith.constant 0 : index
    %1 = vector.load %arg2[%c0_1, %c0_2] : memref<384x30xbf16, #tpu.memory_space<vmem>>, vector<384x30xbf16>
    %cst = arith.constant dense<0.000000e+00> : vector<8x30xf32>
    %2 = tpu.matmul %0, %1, %cst {dimension_numbers = #tpu.dot_dimension_numbers<[1], [0], [0], [1], [0, 0, 1, 1], [], []>} : vector<8x384xbf16>, vector<384x30xbf16>, vector<8x30xf32> -> vector<8x30xf32>
    %c0_3 = arith.constant 0 : index
    %c0_4 = arith.constant 0 : index
    %3 = vector.load %arg3[%c0_3, %c0_4] : memref<1x30xf32, #tpu.memory_space<vmem>>, vector<1x30xf32>
    %4 = vector.broadcast %3 : vector<1x30xf32> to vector<8x30xf32>
    %5 = arith.addf %2, %4 : vector<8x30xf32>
    %cst_5 = arith.constant 0.000000e+00 : f32
    %6 = vector.broadcast %cst_5 : f32 to vector<8x30xf32>
    %7 = arith.maximumf %5, %6 : vector<8x30xf32>
    %8 = arith.truncf %7 : vector<8x30xf32> to vector<8x30xbf16>
    %c0_6 = arith.constant 0 : index
    %c0_7 = arith.constant 0 : index
    %9 = vector.load %arg4[%c0_6, %c0_7] : memref<30x30xbf16, #tpu.memory_space<vmem>>, vector<30x30xbf16>
    %cst_8 = arith.constant dense<0.000000e+00> : vector<8x30xf32>
    %10 = tpu.matmul %8, %9, %cst_8 {dimension_numbers = #tpu.dot_dimension_numbers<[1], [0], [0], [1], [0, 0, 1, 1], [], []>} : vector<8x30xbf16>, vector<30x30xbf16>, vector<8x30xf32> -> vector<8x30xf32>
    %c0_9 = arith.constant 0 : index
    %c0_10 = arith.constant 0 : index
    %11 = vector.load %arg5[%c0_9, %c0_10] : memref<1x30xf32, #tpu.memory_space<vmem>>, vector<1x30xf32>
    %12 = vector.broadcast %11 : vector<1x30xf32> to vector<8x30xf32>
    %13 = arith.addf %10, %12 : vector<8x30xf32>
    %cst_11 = arith.constant 0.000000e+00 : f32
    %14 = vector.broadcast %cst_11 : f32 to vector<8x30xf32>
    %15 = arith.maximumf %13, %14 : vector<8x30xf32>
    %16 = arith.truncf %15 : vector<8x30xf32> to vector<8x30xbf16>
    %c0_12 = arith.constant 0 : index
    %c0_13 = arith.constant 0 : index
    %17 = vector.load %arg6[%c0_12, %c0_13] : memref<30x30xbf16, #tpu.memory_space<vmem>>, vector<30x30xbf16>
    %cst_14 = arith.constant dense<0.000000e+00> : vector<8x30xf32>
    %18 = tpu.matmul %16, %17, %cst_14 {dimension_numbers = #tpu.dot_dimension_numbers<[1], [0], [0], [1], [0, 0, 1, 1], [], []>} : vector<8x30xbf16>, vector<30x30xbf16>, vector<8x30xf32> -> vector<8x30xf32>
    %c0_15 = arith.constant 0 : index
    %c0_16 = arith.constant 0 : index
    %19 = vector.load %arg7[%c0_15, %c0_16] : memref<1x30xf32, #tpu.memory_space<vmem>>, vector<1x30xf32>
    %20 = vector.broadcast %19 : vector<1x30xf32> to vector<8x30xf32>
    %21 = arith.addf %18, %20 : vector<8x30xf32>
    %cst_17 = arith.constant 0.000000e+00 : f32
    %22 = vector.broadcast %cst_17 : f32 to vector<8x30xf32>
    %23 = arith.maximumf %21, %22 : vector<8x30xf32>
    %24 = arith.truncf %23 : vector<8x30xf32> to vector<8x30xbf16>
    %c0_18 = arith.constant 0 : index
    %c0_19 = arith.constant 0 : index
    %25 = vector.load %arg8[%c0_18, %c0_19] : memref<30x96xbf16, #tpu.memory_space<vmem>>, vector<30x96xbf16>
    %cst_20 = arith.constant dense<0.000000e+00> : vector<8x96xf32>
    %26 = tpu.matmul %24, %25, %cst_20 {dimension_numbers = #tpu.dot_dimension_numbers<[1], [0], [0], [1], [0, 0, 1, 1], [], []>} : vector<8x30xbf16>, vector<30x96xbf16>, vector<8x96xf32> -> vector<8x96xf32>
    %c0_21 = arith.constant 0 : index
    %c0_22 = arith.constant 0 : index
    %27 = vector.load %arg9[%c0_21, %c0_22] : memref<1x96xf32, #tpu.memory_space<vmem>>, vector<1x96xf32>
    %28 = vector.broadcast %27 : vector<1x96xf32> to vector<8x96xf32>
    %29 = arith.addf %26, %28 : vector<8x96xf32>
    %30 = vector.extract_strided_slice %29 {offsets = [0, 93], sizes = [8, 3], strides = [1, 1]} : vector<8x96xf32> to vector<8x3xf32>
    %31 = vector.extract_strided_slice %30 {offsets = [0, 0], sizes = [8, 1], strides = [1, 1]} : vector<8x3xf32> to vector<8x1xf32>
    %32 = vector.extract_strided_slice %30 {offsets = [0, 1], sizes = [8, 1], strides = [1, 1]} : vector<8x3xf32> to vector<8x1xf32>
    %33 = vector.extract_strided_slice %30 {offsets = [0, 2], sizes = [8, 1], strides = [1, 1]} : vector<8x3xf32> to vector<8x1xf32>
    %34 = math.sin %31 : vector<8x1xf32>
    %cst_23 = arith.constant 4.905000e-01 : f32
    %35 = vector.broadcast %cst_23 : f32 to vector<8x1xf32>
    %36 = arith.mulf %35, %34 : vector<8x1xf32>
    %37 = arith.subf %32, %36 : vector<8x1xf32>
    %cst_24 = arith.constant 5.000000e-02 : f32
    %38 = vector.broadcast %cst_24 : f32 to vector<8x1xf32>
    %39 = arith.mulf %38, %37 : vector<8x1xf32>
    %40 = arith.addf %31, %39 : vector<8x1xf32>
    %41 = math.sin %40 : vector<8x1xf32>
    %cst_25 = arith.constant 4.905000e-01 : f32
    %42 = vector.broadcast %cst_25 : f32 to vector<8x1xf32>
    %43 = arith.mulf %42, %41 : vector<8x1xf32>
    %44 = arith.subf %37, %43 : vector<8x1xf32>
    %cst_26 = arith.constant 5.000000e-02 : f32
    %45 = vector.broadcast %cst_26 : f32 to vector<8x1xf32>
    %46 = arith.mulf %45, %44 : vector<8x1xf32>
    %47 = arith.addf %40, %46 : vector<8x1xf32>
    %48 = math.sin %47 : vector<8x1xf32>
    %cst_27 = arith.constant 4.905000e-01 : f32
    %49 = vector.broadcast %cst_27 : f32 to vector<8x1xf32>
    %50 = arith.mulf %49, %48 : vector<8x1xf32>
    %51 = arith.subf %44, %50 : vector<8x1xf32>
    %cst_28 = arith.constant 5.000000e-02 : f32
    %52 = vector.broadcast %cst_28 : f32 to vector<8x1xf32>
    %53 = arith.mulf %52, %51 : vector<8x1xf32>
    %54 = arith.addf %47, %53 : vector<8x1xf32>
    %55 = math.sin %54 : vector<8x1xf32>
    %cst_29 = arith.constant 4.905000e-01 : f32
    %56 = vector.broadcast %cst_29 : f32 to vector<8x1xf32>
    %57 = arith.mulf %56, %55 : vector<8x1xf32>
    %58 = arith.subf %51, %57 : vector<8x1xf32>
    %cst_30 = arith.constant 5.000000e-02 : f32
    %59 = vector.broadcast %cst_30 : f32 to vector<8x1xf32>
    %60 = arith.mulf %59, %58 : vector<8x1xf32>
    %61 = arith.addf %54, %60 : vector<8x1xf32>
    %62 = math.sin %61 : vector<8x1xf32>
    %cst_31 = arith.constant 4.905000e-01 : f32
    %63 = vector.broadcast %cst_31 : f32 to vector<8x1xf32>
    %64 = arith.mulf %63, %62 : vector<8x1xf32>
    %65 = arith.subf %58, %64 : vector<8x1xf32>
    %cst_32 = arith.constant 5.000000e-02 : f32
    %66 = vector.broadcast %cst_32 : f32 to vector<8x1xf32>
    %67 = arith.mulf %66, %65 : vector<8x1xf32>
    %68 = arith.addf %61, %67 : vector<8x1xf32>
    %69 = math.sin %68 : vector<8x1xf32>
    %cst_33 = arith.constant 4.905000e-01 : f32
    %70 = vector.broadcast %cst_33 : f32 to vector<8x1xf32>
    %71 = arith.mulf %70, %69 : vector<8x1xf32>
    %72 = arith.subf %65, %71 : vector<8x1xf32>
    %cst_34 = arith.constant 5.000000e-02 : f32
    %73 = vector.broadcast %cst_34 : f32 to vector<8x1xf32>
    %74 = arith.mulf %73, %72 : vector<8x1xf32>
    %75 = arith.addf %68, %74 : vector<8x1xf32>
    %76 = math.sin %75 : vector<8x1xf32>
    %cst_35 = arith.constant 4.905000e-01 : f32
    %77 = vector.broadcast %cst_35 : f32 to vector<8x1xf32>
    %78 = arith.mulf %77, %76 : vector<8x1xf32>
    %79 = arith.subf %72, %78 : vector<8x1xf32>
    %cst_36 = arith.constant 5.000000e-02 : f32
    %80 = vector.broadcast %cst_36 : f32 to vector<8x1xf32>
    %81 = arith.mulf %80, %79 : vector<8x1xf32>
    %82 = arith.addf %75, %81 : vector<8x1xf32>
    %83 = math.sin %82 : vector<8x1xf32>
    %cst_37 = arith.constant 4.905000e-01 : f32
    %84 = vector.broadcast %cst_37 : f32 to vector<8x1xf32>
    %85 = arith.mulf %84, %83 : vector<8x1xf32>
    %86 = arith.subf %79, %85 : vector<8x1xf32>
    %cst_38 = arith.constant 5.000000e-02 : f32
    %87 = vector.broadcast %cst_38 : f32 to vector<8x1xf32>
    %88 = arith.mulf %87, %86 : vector<8x1xf32>
    %89 = arith.addf %82, %88 : vector<8x1xf32>
    %90 = tpu.concatenate %40, %37, %33, %47, %44, %33, %54, %51, %33, %61, %58, %33, %68, %65, %33, %75 in 1 : vector<8x1xf32>, vector<8x1xf32>, vector<8x1xf32>, vector<8x1xf32>, vector<8x1xf32>, vector<8x1xf32>, vector<8x1xf32>, vector<8x1xf32>, vector<8x1xf32>, vector<8x1xf32>, vector<8x1xf32>, vector<8x1xf32>, vector<8x1xf32>, vector<8x1xf32>, vector<8x1xf32>, vector<8x1xf32> -> vector<8x16xf32>
    %91 = tpu.concatenate %72, %33, %82, %79, %33, %89, %86, %33 in 1 : vector<8x1xf32>, vector<8x1xf32>, vector<8x1xf32>, vector<8x1xf32>, vector<8x1xf32>, vector<8x1xf32>, vector<8x1xf32>, vector<8x1xf32> -> vector<8x8xf32>
    %92 = tpu.concatenate %90, %91 in 1 : vector<8x16xf32>, vector<8x8xf32> -> vector<8x24xf32>
    %93 = tpu.concatenate %29, %92 in 1 : vector<8x96xf32>, vector<8x24xf32> -> vector<8x120xf32>
    %94 = arith.truncf %93 : vector<8x120xf32> to vector<8x120xbf16>
    %c0_39 = arith.constant 0 : index
    %c0_40 = arith.constant 0 : index
    %95 = vector.load %arg10[%c0_39, %c0_40] : memref<120x30xbf16, #tpu.memory_space<vmem>>, vector<120x30xbf16>
    %cst_41 = arith.constant dense<0.000000e+00> : vector<8x30xf32>
    %96 = tpu.matmul %94, %95, %cst_41 {dimension_numbers = #tpu.dot_dimension_numbers<[1], [0], [0], [1], [0, 0, 1, 1], [], []>} : vector<8x120xbf16>, vector<120x30xbf16>, vector<8x30xf32> -> vector<8x30xf32>
    %c0_42 = arith.constant 0 : index
    %c0_43 = arith.constant 0 : index
    %97 = vector.load %arg11[%c0_42, %c0_43] : memref<1x30xf32, #tpu.memory_space<vmem>>, vector<1x30xf32>
    %98 = vector.broadcast %97 : vector<1x30xf32> to vector<8x30xf32>
    %99 = arith.addf %96, %98 : vector<8x30xf32>
    %cst_44 = arith.constant 0.000000e+00 : f32
    %100 = vector.broadcast %cst_44 : f32 to vector<8x30xf32>
    %101 = arith.maximumf %99, %100 : vector<8x30xf32>
    %102 = arith.truncf %101 : vector<8x30xf32> to vector<8x30xbf16>
    %c0_45 = arith.constant 0 : index
    %c0_46 = arith.constant 0 : index
    %103 = vector.load %arg12[%c0_45, %c0_46] : memref<30x30xbf16, #tpu.memory_space<vmem>>, vector<30x30xbf16>
    %cst_47 = arith.constant dense<0.000000e+00> : vector<8x30xf32>
    %104 = tpu.matmul %102, %103, %cst_47 {dimension_numbers = #tpu.dot_dimension_numbers<[1], [0], [0], [1], [0, 0, 1, 1], [], []>} : vector<8x30xbf16>, vector<30x30xbf16>, vector<8x30xf32> -> vector<8x30xf32>
    %c0_48 = arith.constant 0 : index
    %c0_49 = arith.constant 0 : index
    %105 = vector.load %arg13[%c0_48, %c0_49] : memref<1x30xf32, #tpu.memory_space<vmem>>, vector<1x30xf32>
    %106 = vector.broadcast %105 : vector<1x30xf32> to vector<8x30xf32>
    %107 = arith.addf %104, %106 : vector<8x30xf32>
    %cst_50 = arith.constant 0.000000e+00 : f32
    %108 = vector.broadcast %cst_50 : f32 to vector<8x30xf32>
    %109 = arith.maximumf %107, %108 : vector<8x30xf32>
    %110 = arith.truncf %109 : vector<8x30xf32> to vector<8x30xbf16>
    %c0_51 = arith.constant 0 : index
    %c0_52 = arith.constant 0 : index
    %111 = vector.load %arg14[%c0_51, %c0_52] : memref<30x30xbf16, #tpu.memory_space<vmem>>, vector<30x30xbf16>
    %cst_53 = arith.constant dense<0.000000e+00> : vector<8x30xf32>
    %112 = tpu.matmul %110, %111, %cst_53 {dimension_numbers = #tpu.dot_dimension_numbers<[1], [0], [0], [1], [0, 0, 1, 1], [], []>} : vector<8x30xbf16>, vector<30x30xbf16>, vector<8x30xf32> -> vector<8x30xf32>
    %c0_54 = arith.constant 0 : index
    %c0_55 = arith.constant 0 : index
    %113 = vector.load %arg15[%c0_54, %c0_55] : memref<1x30xf32, #tpu.memory_space<vmem>>, vector<1x30xf32>
    %114 = vector.broadcast %113 : vector<1x30xf32> to vector<8x30xf32>
    %115 = arith.addf %112, %114 : vector<8x30xf32>
    %cst_56 = arith.constant 0.000000e+00 : f32
    %116 = vector.broadcast %cst_56 : f32 to vector<8x30xf32>
    %117 = arith.maximumf %115, %116 : vector<8x30xf32>
    %118 = arith.truncf %117 : vector<8x30xf32> to vector<8x30xbf16>
    %c0_57 = arith.constant 0 : index
    %c0_58 = arith.constant 0 : index
    %119 = vector.load %arg16[%c0_57, %c0_58] : memref<30x120xbf16, #tpu.memory_space<vmem>>, vector<30x120xbf16>
    %cst_59 = arith.constant dense<0.000000e+00> : vector<8x120xf32>
    %120 = tpu.matmul %118, %119, %cst_59 {dimension_numbers = #tpu.dot_dimension_numbers<[1], [0], [0], [1], [0, 0, 1, 1], [], []>} : vector<8x30xbf16>, vector<30x120xbf16>, vector<8x120xf32> -> vector<8x120xf32>
    %c0_60 = arith.constant 0 : index
    %c0_61 = arith.constant 0 : index
    %121 = vector.load %arg17[%c0_60, %c0_61] : memref<1x120xf32, #tpu.memory_space<vmem>>, vector<1x120xf32>
    %122 = vector.broadcast %121 : vector<1x120xf32> to vector<8x120xf32>
    %123 = arith.addf %120, %122 : vector<8x120xf32>
    %124 = arith.addf %93, %123 : vector<8x120xf32>
    %125 = arith.truncf %124 : vector<8x120xf32> to vector<8x120xbf16>
    %c0_62 = arith.constant 0 : index
    %c0_63 = arith.constant 0 : index
    %126 = vector.load %arg18[%c0_62, %c0_63] : memref<120x30xbf16, #tpu.memory_space<vmem>>, vector<120x30xbf16>
    %cst_64 = arith.constant dense<0.000000e+00> : vector<8x30xf32>
    %127 = tpu.matmul %125, %126, %cst_64 {dimension_numbers = #tpu.dot_dimension_numbers<[1], [0], [0], [1], [0, 0, 1, 1], [], []>} : vector<8x120xbf16>, vector<120x30xbf16>, vector<8x30xf32> -> vector<8x30xf32>
    %c0_65 = arith.constant 0 : index
    %c0_66 = arith.constant 0 : index
    %128 = vector.load %arg19[%c0_65, %c0_66] : memref<1x30xf32, #tpu.memory_space<vmem>>, vector<1x30xf32>
    %129 = vector.broadcast %128 : vector<1x30xf32> to vector<8x30xf32>
    %130 = arith.addf %127, %129 : vector<8x30xf32>
    %cst_67 = arith.constant 0.000000e+00 : f32
    %131 = vector.broadcast %cst_67 : f32 to vector<8x30xf32>
    %132 = arith.maximumf %130, %131 : vector<8x30xf32>
    %133 = arith.truncf %132 : vector<8x30xf32> to vector<8x30xbf16>
    %c0_68 = arith.constant 0 : index
    %c0_69 = arith.constant 0 : index
    %134 = vector.load %arg20[%c0_68, %c0_69] : memref<30x30xbf16, #tpu.memory_space<vmem>>, vector<30x30xbf16>
    %cst_70 = arith.constant dense<0.000000e+00> : vector<8x30xf32>
    %135 = tpu.matmul %133, %134, %cst_70 {dimension_numbers = #tpu.dot_dimension_numbers<[1], [0], [0], [1], [0, 0, 1, 1], [], []>} : vector<8x30xbf16>, vector<30x30xbf16>, vector<8x30xf32> -> vector<8x30xf32>
    %c0_71 = arith.constant 0 : index
    %c0_72 = arith.constant 0 : index
    %136 = vector.load %arg21[%c0_71, %c0_72] : memref<1x30xf32, #tpu.memory_space<vmem>>, vector<1x30xf32>
    %137 = vector.broadcast %136 : vector<1x30xf32> to vector<8x30xf32>
    %138 = arith.addf %135, %137 : vector<8x30xf32>
    %cst_73 = arith.constant 0.000000e+00 : f32
    %139 = vector.broadcast %cst_73 : f32 to vector<8x30xf32>
    %140 = arith.maximumf %138, %139 : vector<8x30xf32>
    %141 = arith.truncf %140 : vector<8x30xf32> to vector<8x30xbf16>
    %c0_74 = arith.constant 0 : index
    %c0_75 = arith.constant 0 : index
    %142 = vector.load %arg22[%c0_74, %c0_75] : memref<30x30xbf16, #tpu.memory_space<vmem>>, vector<30x30xbf16>
    %cst_76 = arith.constant dense<0.000000e+00> : vector<8x30xf32>
    %143 = tpu.matmul %141, %142, %cst_76 {dimension_numbers = #tpu.dot_dimension_numbers<[1], [0], [0], [1], [0, 0, 1, 1], [], []>} : vector<8x30xbf16>, vector<30x30xbf16>, vector<8x30xf32> -> vector<8x30xf32>
    %c0_77 = arith.constant 0 : index
    %c0_78 = arith.constant 0 : index
    %144 = vector.load %arg23[%c0_77, %c0_78] : memref<1x30xf32, #tpu.memory_space<vmem>>, vector<1x30xf32>
    %145 = vector.broadcast %144 : vector<1x30xf32> to vector<8x30xf32>
    %146 = arith.addf %143, %145 : vector<8x30xf32>
    %cst_79 = arith.constant 0.000000e+00 : f32
    %147 = vector.broadcast %cst_79 : f32 to vector<8x30xf32>
    %148 = arith.maximumf %146, %147 : vector<8x30xf32>
    %149 = arith.truncf %148 : vector<8x30xf32> to vector<8x30xbf16>
    %c0_80 = arith.constant 0 : index
    %c0_81 = arith.constant 0 : index
    %150 = vector.load %arg24[%c0_80, %c0_81] : memref<30x128xbf16, #tpu.memory_space<vmem>>, vector<30x128xbf16>
    %cst_82 = arith.constant dense<0.000000e+00> : vector<8x128xf32>
    %151 = tpu.matmul %149, %150, %cst_82 {dimension_numbers = #tpu.dot_dimension_numbers<[1], [0], [0], [1], [0, 0, 1, 1], [], []>} : vector<8x30xbf16>, vector<30x128xbf16>, vector<8x128xf32> -> vector<8x128xf32>
    %c0_83 = arith.constant 0 : index
    %c0_84 = arith.constant 0 : index
    %152 = vector.load %arg25[%c0_83, %c0_84] : memref<1x128xf32, #tpu.memory_space<vmem>>, vector<1x128xf32>
    %153 = vector.broadcast %152 : vector<1x128xf32> to vector<8x128xf32>
    %154 = arith.addf %151, %153 : vector<8x128xf32>
    %c0_85 = arith.constant 0 : index
    %c0_86 = arith.constant 0 : index
    %155 = vector.load %arg26[%c0_85, %c0_86] : memref<8x128xf32, #tpu.memory_space<vmem>>, vector<8x128xf32>
    tpu.vector_store %arg26[%c0_85, %c0_86], %154 {strides = array<i32>} : memref<8x128xf32, #tpu.memory_space<vmem>>, vector<8x128xf32>,
    return
  }
  func.func @transform_0(%arg0: i32) -> (i32, i32) {
    %c0_i32 = arith.constant 0 : i32
    %c0_i32_0 = arith.constant 0 : i32
    return %arg0, %c0_i32 : i32, i32
  }
  func.func @transform_1(%arg0: i32) -> (i32, i32) {
    %c0_i32 = arith.constant 0 : i32
    %c0_i32_0 = arith.constant 0 : i32
    %c0_i32_1 = arith.constant 0 : i32
    return %c0_i32, %c0_i32_0 : i32, i32
  }
  func.func @transform_2(%arg0: i32) -> (i32, i32) {
    %c0_i32 = arith.constant 0 : i32
    %c0_i32_0 = arith.constant 0 : i32
    %c0_i32_1 = arith.constant 0 : i32
    return %c0_i32, %c0_i32_0 : i32, i32
  }
  func.func @transform_3(%arg0: i32) -> (i32, i32) {
    %c0_i32 = arith.constant 0 : i32
    %c0_i32_0 = arith.constant 0 : i32
    %c0_i32_1 = arith.constant 0 : i32
    return %c0_i32, %c0_i32_0 : i32, i32
  }
  func.func @transform_4(%arg0: i32) -> (i32, i32) {
    %c0_i32 = arith.constant 0 : i32
    %c0_i32_0 = arith.constant 0 : i32
    %c0_i32_1 = arith.constant 0 : i32
    return %c0_i32, %c0_i32_0 : i32, i32
  }
  func.func @transform_5(%arg0: i32) -> (i32, i32) {
    %c0_i32 = arith.constant 0 : i32
    %c0_i32_0 = arith.constant 0 : i32
    %c0_i32_1 = arith.constant 0 : i32
    return %c0_i32, %c0_i32_0 : i32, i32
  }
  func.func @transform_6(%arg0: i32) -> (i32, i32) {
    %c0_i32 = arith.constant 0 : i32
    %c0_i32_0 = arith.constant 0 : i32
    %c0_i32_1 = arith.constant 0 : i32
    return %c0_i32, %c0_i32_0 : i32, i32
  }
  func.func @transform_7(%arg0: i32) -> (i32, i32) {
    %c0_i32 = arith.constant 0 : i32
    %c0_i32_0 = arith.constant 0 : i32
    %c0_i32_1 = arith.constant 0 : i32
    return %c0_i32, %c0_i32_0 : i32, i32
  }
  func.func @transform_8(%arg0: i32) -> (i32, i32) {
    %c0_i32 = arith.constant 0 : i32
    %c0_i32_0 = arith.constant 0 : i32
    %c0_i32_1 = arith.constant 0 : i32
    return %c0_i32, %c0_i32_0 : i32, i32
  }
  func.func @transform_9(%arg0: i32) -> (i32, i32) {
    %c0_i32 = arith.constant 0 : i32
    %c0_i32_0 = arith.constant 0 : i32
    %c0_i32_1 = arith.constant 0 : i32
    return %c0_i32, %c0_i32_0 : i32, i32
  }
  func.func @transform_10(%arg0: i32) -> (i32, i32) {
    %c0_i32 = arith.constant 0 : i32
    %c0_i32_0 = arith.constant 0 : i32
    %c0_i32_1 = arith.constant 0 : i32
    return %c0_i32, %c0_i32_0 : i32, i32
  }
  func.func @transform_11(%arg0: i32) -> (i32, i32) {
    %c0_i32 = arith.constant 0 : i32
    %c0_i32_0 = arith.constant 0 : i32
    %c0_i32_1 = arith.constant 0 : i32
    return %c0_i32, %c0_i32_0 : i32, i32
  }
  func.func @transform_12(%arg0: i32) -> (i32, i32) {
    %c0_i32 = arith.constant 0 : i32
    %c0_i32_0 = arith.constant 0 : i32
    %c0_i32_1 = arith.constant 0 : i32
    return %c0_i32, %c0_i32_0 : i32, i32
  }
  func.func @transform_13(%arg0: i32) -> (i32, i32) {
    %c0_i32 = arith.constant 0 : i32
    %c0_i32_0 = arith.constant 0 : i32
    %c0_i32_1 = arith.constant 0 : i32
    return %c0_i32, %c0_i32_0 : i32, i32
  }
  func.func @transform_14(%arg0: i32) -> (i32, i32) {
    %c0_i32 = arith.constant 0 : i32
    %c0_i32_0 = arith.constant 0 : i32
    %c0_i32_1 = arith.constant 0 : i32
    return %c0_i32, %c0_i32_0 : i32, i32
  }
  func.func @transform_15(%arg0: i32) -> (i32, i32) {
    %c0_i32 = arith.constant 0 : i32
    %c0_i32_0 = arith.constant 0 : i32
    %c0_i32_1 = arith.constant 0 : i32
    return %c0_i32, %c0_i32_0 : i32, i32
  }
  func.func @transform_16(%arg0: i32) -> (i32, i32) {
    %c0_i32 = arith.constant 0 : i32
    %c0_i32_0 = arith.constant 0 : i32
    %c0_i32_1 = arith.constant 0 : i32
    return %c0_i32, %c0_i32_0 : i32, i32
  }
  func.func @transform_17(%arg0: i32) -> (i32, i32) {
    %c0_i32 = arith.constant 0 : i32
    %c0_i32_0 = arith.constant 0 : i32
    %c0_i32_1 = arith.constant 0 : i32
    return %c0_i32, %c0_i32_0 : i32, i32
  }
  func.func @transform_18(%arg0: i32) -> (i32, i32) {
    %c0_i32 = arith.constant 0 : i32
    %c0_i32_0 = arith.constant 0 : i32
    %c0_i32_1 = arith.constant 0 : i32
    return %c0_i32, %c0_i32_0 : i32, i32
  }
  func.func @transform_19(%arg0: i32) -> (i32, i32) {
    %c0_i32 = arith.constant 0 : i32
    %c0_i32_0 = arith.constant 0 : i32
    %c0_i32_1 = arith.constant 0 : i32
    return %c0_i32, %c0_i32_0 : i32, i32
  }
  func.func @transform_20(%arg0: i32) -> (i32, i32) {
    %c0_i32 = arith.constant 0 : i32
    %c0_i32_0 = arith.constant 0 : i32
    %c0_i32_1 = arith.constant 0 : i32
    return %c0_i32, %c0_i32_0 : i32, i32
  }
  func.func @transform_21(%arg0: i32) -> (i32, i32) {
    %c0_i32 = arith.constant 0 : i32
    %c0_i32_0 = arith.constant 0 : i32
    %c0_i32_1 = arith.constant 0 : i32
    return %c0_i32, %c0_i32_0 : i32, i32
  }
  func.func @transform_22(%arg0: i32) -> (i32, i32) {
    %c0_i32 = arith.constant 0 : i32
    %c0_i32_0 = arith.constant 0 : i32
    %c0_i32_1 = arith.constant 0 : i32
    return %c0_i32, %c0_i32_0 : i32, i32
  }
  func.func @transform_23(%arg0: i32) -> (i32, i32) {
    %c0_i32 = arith.constant 0 : i32
    %c0_i32_0 = arith.constant 0 : i32
    %c0_i32_1 = arith.constant 0 : i32
    return %c0_i32, %c0_i32_0 : i32, i32
  }
  func.func @transform_24(%arg0: i32) -> (i32, i32) {
    %c0_i32 = arith.constant 0 : i32
    %c0_i32_0 = arith.constant 0 : i32
    %c0_i32_1 = arith.constant 0 : i32
    return %c0_i32, %c0_i32_0 : i32, i32
  }
  func.func @transform_25(%arg0: i32) -> (i32, i32) {
    %c0_i32 = arith.constant 0 : i32
    %c0_i32_0 = arith.constant 0 : i32
    return %arg0, %c0_i32 : i32, i32
  }
}

</mosaic_0001>

<bundles_post_ra>
// kernel: hybrid_rwm_forward.1
= control target key start
LH: loop header
LB: loop body
LE: loop exit
PB: predicated region body
PF: predicated region fallthrough
CT: control target
= control target key end

     0   :  { %v2777_v1 = vmov 0.0   ;;  %vm2778_vm0 = vmmov 0   ;;  %vm401_vm1 = vcmask 1046528   ;;  %vm397_vm2 = vcmask 244736   ;;  %s2785_s27 = smov 1   ;;  %s2787_s28 = smov 34   ;;  %s3586_s1 = inlined_call_operand.vmem [shape: bf16[384,30], index: 1, kind: input, shape index: {}]   ;;  %s3587_s0 = inlined_call_operand.vmem [shape: bf16[8,384], index: 0, kind: input, shape index: {}]   ;;  %s3588_s3 = inlined_call_operand.vmem [shape: bf16[30,30], index: 3, kind: input, shape index: {}]   ;;  %s3589_s5 = inlined_call_operand.vmem [shape: bf16[30,30], index: 5, kind: input, shape index: {}]   ;;  %s3590_s2 = inlined_call_operand.vmem [shape: f32[1,30], index: 2, kind: input, shape index: {}]   ;;  %s3591_s7 = inlined_call_operand.vmem [shape: bf16[30,96], index: 7, kind: input, shape index: {}]   ;;  %s3592_s4 = inlined_call_operand.vmem [shape: f32[1,30], index: 4, kind: input, shape index: {}]   ;;  %s3593_s6 = inlined_call_operand.vmem [shape: f32[1,30], index: 6, kind: input, shape index: {}]   ;;  %s3594_s8 = inlined_call_operand.vmem [shape: f32[1,96], index: 8, kind: input, shape index: {}]   ;;  %s3595_s9 = inlined_call_operand.vmem [shape: bf16[120,30], index: 9, kind: input, shape index: {}]   ;;  %s3596_s11 = inlined_call_operand.vmem [shape: bf16[30,30], index: 11, kind: input, shape index: {}]   ;;  %s3597_s13 = inlined_call_operand.vmem [shape: bf16[30,30], index: 13, kind: input, shape index: {}]   ;;  %s3598_s10 = inlined_call_operand.vmem [shape: f32[1,30], index: 10, kind: input, shape index: {}]   ;;  %s3599_s15 = inlined_call_operand.vmem [shape: bf16[30,120], index: 15, kind: input, shape index: {}]   ;;  %s3600_s12 = inlined_call_operand.vmem [shape: f32[1,30], index: 12, kind: input, shape index: {}]   ;;  %s3601_s17 = inlined_call_operand.vmem [shape: bf16[120,30], index: 17, kind: input, shape index: {}]   ;;  %s3602_s14 = inlined_call_operand.vmem [shape: f32[1,30], index: 14, kind: input, shape index: {}]   ;;  %s3603_s19 = inlined_call_operand.vmem [shape: bf16[30,30], index: 19, kind: input, shape index: {}]   ;;  %s3604_s16 = inlined_call_operand.vmem [shape: f32[1,120], index: 16, kind: input, shape index: {}]   ;;  %s3605_s21 = inlined_call_operand.vmem [shape: bf16[30,30], index: 21, kind: input, shape index: {}]   ;;  %s3606_s18 = inlined_call_operand.vmem [shape: f32[1,30], index: 18, kind: input, shape index: {}]   ;;  %s3607_s23 = inlined_call_operand.vmem [shape: bf16[30,128], index: 23, kind: input, shape index: {}]   ;;  %s3608_s20 = inlined_call_operand.vmem [shape: f32[1,30], index: 20, kind: input, shape index: {}]   ;;  %s3609_s22 = inlined_call_operand.vmem [shape: f32[1,30], index: 22, kind: input, shape index: {}]   ;;  %s3610_s24 = inlined_call_operand.vmem [shape: f32[1,128], index: 24, kind: input, shape index: {}]   ;;  %s3611_s25 = inlined_call_operand.vmem [shape: f32[8,128], index: 25, kind: output, shape index: {}]  }
   0x1   :  { %3618 = sst [smem:[#allocation2_spill]] %s3586_s1  ;;  %2499 = vmatprep.subr.bf16.mxu1 %v2777_v1  ;;  %2515 = vmatprep.mubr.msk.bf16.mxu1 %vm2778_vm0, %v2777_v1  ;;  %s2792_s29 = smov 41  }
   0x2   :  { %3619 = sst [smem:[#allocation3_spill]] %s3587_s0 }
   0x3   :  { %3620 = sst [smem:[#allocation4_spill]] %s3588_s3  ;;  %s3629_s30 = sld [smem:[#allocation3_spill]] }
   0x4   :  { %3621 = sst [smem:[#allocation5_spill]] %s3589_s5  ;;  %s2793_s3 = smov 44  }
   0x5   :  { %3622 = sst [smem:[#allocation6_spill]] %s3590_s2  ;;  %s2786_s2 = smov 127  }
   0x6   :  { %3623 = sst [smem:[#allocation7_spill]] %s3591_s7  ;;  %s3630_s7 = sld [smem:[#allocation4_spill]] }
   0x7   :  { %3624 = sst [smem:[#allocation8_spill]] %s3592_s4  ;;  %s3628_s4 = sld [smem:[#allocation2_spill]] }
   0x8   :  { %3625 = sst [smem:[#allocation9_spill]] %s3593_s6  ;;  %s3631_s6 = sld [smem:[#allocation5_spill]] }
   0x9   :  { %3626 = sst [smem:[#allocation10_spill]] %s3594_s8  ;;  %v81_v22 = vld [vmem:[%s3629_s30] sm:$0xff]  ;;  %v2709_v28 = vld [vmem:[%s3629_s30 + $0x8] ss:$0 sps:$4 sm:$0xff]   ;;  %s3632_s0 = sld [smem:[#allocation6_spill]] }
   0xa   :  { %3627 = sst [smem:[#allocation11_spill]] %s3595_s9  ;;  %v2309_v24 = vcombine.high %v81_v22, %v81_v22  ;;  %v2308_v27 = vcombine.low %v81_v22, %v81_v22  ;;  %s3634_s1 = sld [smem:[#allocation8_spill]] }
   0xb   :  { %s3635_s5 = sld [smem:[#allocation9_spill]]  ;;  %s3636_s8 = sld [smem:[#allocation10_spill]] }
   0xc   :  { %325 = vmatprep.mubr.bf16.mxu0 %v2309_v24  ;;  %v2711_v29 = vld [vmem:[%s3630_s7] sm:$0xff]   ;;  %v2712_v30 = vld [vmem:[%s3630_s7 + $0x8] sm:$0x7f]   ;;  %s2789_s9 = smov 40   ;;  %s2790_s7 = smov 35  }
   0xd   :  { %v2684_v0 = vld [vmem:[%s3628_s4 + $0x40] sm:$0xff]   ;;  %v2687_v4 = vld [vmem:[%s3628_s4 + $0x48] sm:$0xff]   ;;  %v2690_v7 = vld [vmem:[%s3628_s4 + $0x50] sm:$0xff]   ;;  %v403_v31 = vsel %vm401_vm1, %v2712_v30, 0  ;;  %s2794_s30 = smov 47  }
   0xe   :  { %v2685_v2 = vld [vmem:[%s3628_s4] sm:$0xff]   ;;  %2423 = vmatprep.subr.bf16.mxu0 %v2684_v0  ;;  %v2688_v5 = vld [vmem:[%s3628_s4 + $0x8] sm:$0xff]   ;;  %v2691_v8 = vld [vmem:[%s3628_s4 + $0x10] sm:$0xff]  }
   0xf   :  { %v2686_v3 = vld [vmem:[%s3628_s4 + $0x80] sm:$0xff]   ;;  %2424 = vmatpush3.bf16.msra.mxu0 %v2685_v2  ;;  %v2689_v6 = vld [vmem:[%s3628_s4 + $0x88] sm:$0xff]   ;;  %v2692_v9 = vld [vmem:[%s3628_s4 + $0x90] sm:$0xff]  }
  0x10   :  { %2500 = vmatpush3.bf16.msra.mxu1 %v2686_v3  ;;  %2425 = vmatprep.subr.bf16.mxu0 %v2687_v4  ;;  %v2693_v10 = vld [vmem:[%s3628_s4 + $0x58] sm:$0xff]   ;;  %v2696_v13 = vld [vmem:[%s3628_s4 + $0x60] sm:$0xff]   ;;  %v2699_v16 = vld [vmem:[%s3628_s4 + $0x68] sm:$0xff]  }
  0x11   :  { %2501 = vmatprep.subr.bf16.mxu1 %v2777_v1  ;;  %v2694_v11 = vld [vmem:[%s3628_s4 + $0x18] sm:$0xff]   ;;  %v2697_v14 = vld [vmem:[%s3628_s4 + $0x20] sm:$0xff]   ;;  %v2700_v17 = vld [vmem:[%s3628_s4 + $0x28] sm:$0xff]  }
  0x12   :  { %v2695_v12 = vld [vmem:[%s3628_s4 + $0x98] sm:$0xff]   ;;  %v2698_v15 = vld [vmem:[%s3628_s4 + $0xa0] sm:$0xff]   ;;  %v2701_v18 = vld [vmem:[%s3628_s4 + $0xa8] sm:$0xff]  }
  0x13   :  { %2426 = vmatpush3.bf16.msra.mxu0 %v2688_v5  ;;  %v2702_v19 = vld [vmem:[%s3628_s4 + $0x70] sm:$0xff]   ;;  %v2705_v23 = vld [vmem:[%s3628_s4 + $0x78] sm:$0xff]   ;;  %v2713_v32 = vld [vmem:[%s3631_s6] sm:$0xff]  }
  0x14   :  { %2502 = vmatpush3.bf16.msra.mxu1 %v2689_v6  ;;  %2427 = vmatprep.subr.bf16.mxu0 %v2690_v7  ;;  %v2703_v20 = vld [vmem:[%s3628_s4 + $0x30] sm:$0xff]   ;;  %v2706_v25 = vld [vmem:[%s3628_s4 + $0x38] sm:$0xff]   ;;  %v2307_v35 = vld [vmem:[%s3632_s0] ss:$0 sm:$0xff]  ;;  %s3637_s0 = sld [smem:[#allocation11_spill]] }
  0x15   :  { %2503 = vmatprep.subr.bf16.mxu1 %v2777_v1  ;;  %v2704_v21 = vld [vmem:[%s3628_s4 + $0xb0] sm:$0xff]   ;;  %v2710_v26 = vld [vmem:[%s3628_s4 + $0xb8] sm:$0xff]   ;;  %v2714_v47 = vld [vmem:[%s3631_s6 + $0x8] sm:$0x7f]   ;;  %s3633_s4 = sld [smem:[#allocation7_spill]]  ;;  %s2795_s6 = smov 50  }
  0x16   :  { %v473_v48 = vsel %vm401_vm1, %v2714_v47, 0  ;;  %v2335_v50 = vld [vmem:[%s3634_s1] ss:$0 sm:$0xff]  ;;  %s2791_s1 = smov 38  }
  0x17   :  { %2428 = vmatpush3.bf16.msra.mxu0 %v2691_v8  ;;  %v2339_v60 = vld [vmem:[%s3635_s5] ss:$0 sm:$0xff] }
  0x18   :  { %2504 = vmatpush3.bf16.msra.mxu1 %v2692_v9  ;;  %2429 = vmatprep.subr.bf16.mxu0 %v2693_v10  ;;  %v2343_v5 = vld [vmem:[%s3636_s8] ss:$0 sm:$0xff] }
  0x19   :  { %2505 = vmatprep.subr.bf16.mxu1 %v2777_v1 }
  0x1b   :  { %2430 = vmatpush3.bf16.msra.mxu0 %v2694_v11  ;;  %v2715_v49 = vld [vmem:[%s3633_s4] sm:$0xff]   ;;  %v2716_v58 = vld [vmem:[%s3633_s4 + $0x8] sm:$0x7f]   ;;  %s2788_s4 = smov 37  }
  0x1c   :  { %2506 = vmatpush3.bf16.msra.mxu1 %v2695_v12  ;;  %2431 = vmatprep.subr.bf16.mxu0 %v2696_v13  ;;  %v543_v59 = vsel %vm401_vm1, %v2716_v58, 0 }
  0x1d   :  { %2507 = vmatprep.subr.bf16.mxu1 %v2777_v1 }
  0x1f   :  { %2432 = vmatpush3.bf16.msra.mxu0 %v2697_v14 }
  0x20   :  { %2508 = vmatpush3.bf16.msra.mxu1 %v2698_v15  ;;  %2433 = vmatprep.subr.bf16.mxu0 %v2699_v16 }
  0x21   :  { %2509 = vmatprep.subr.bf16.mxu1 %v2777_v1 }
  0x23   :  { %2434 = vmatpush3.bf16.msra.mxu0 %v2700_v17 }
  0x24   :  { %2510 = vmatpush3.bf16.msra.mxu1 %v2701_v18  ;;  %2435 = vmatprep.subr.bf16.mxu0 %v2702_v19 }
  0x25   :  { %2511 = vmatprep.subr.bf16.mxu1 %v2777_v1 }
  0x27   :  { %2436 = vmatpush3.bf16.msra.mxu0 %v2703_v20 }
  0x28   :  { %2512 = vmatpush3.bf16.msra.mxu1 %v2704_v21  ;;  %2437 = vmatprep.subr.bf16.mxu0 %v2705_v23  ;;  %v2779_v21 = vmov 683565275   ;;  %v2780_v23 = vmov 2475754826  }
  0x29   :  { %2513 = vmatprep.subr.bf16.mxu1 %v2777_v1 }
  0x2b   :  { %2438 = vmatpush3.bf16.msra.mxu0 %v2706_v25 }
  0x2c   :  { %2514 = vmatpush3.bf16.msra.mxu1 %v2710_v26  ;;  %2519 = vmatprep.subr.bf16.mxu0 %v2777_v1  ;;  %v2781_v26 = vmov 2131351028  }
  0x2d   :  { %2527 = vmatprep.subr.bf16.mxu1 %v2777_v1 }
  0x2e   :  { %326 = vmatmul.mubr.bf16.vlgmr.msra.gmra.mrb[0].mxu0 %v2308_v27 }
  0x2f   :  { %2516 = vmatmul.mubr.bf16.vlgmr.msra.gmra.mrb[0].mxu1 %v2709_v28  ;;  %2523 = vmatprep.mubr.msk.bf16.mxu0 %vm2778_vm0, %v2777_v1 }
  0x30   :  { %2531 = vmatprep.mubr.msk.bf16.mxu1 %vm2778_vm0, %v2777_v1  ;;  %2520 = vmatpush3.bf16.msra.mxu0 %v2711_v29  ;;  %v2782_v29 = vmov 2102212464  }
  0x31   :  { %2521 = vmatprep.subr.bf16.mxu0 %v2777_v1  ;;  %2528 = vmatpush3.bf16.msra.mxu1 %v2713_v32  ;;  %v2783_v32 = vmov 920167782  }
  0x32   :  { %2529 = vmatprep.subr.bf16.mxu1 %v2777_v1 }
  0x34   :  { %2522 = vmatpush3.bf16.msra.mxu0 %v403_v31 }
  0x35   :  { %2535 = vmatprep.subr.bf16.mxu0 %v2777_v1  ;;  %2530 = vmatpush3.bf16.msra.mxu1 %v473_v48 }
  0x36   :  { %2543 = vmatprep.subr.bf16.mxu1 %v2777_v1 }
 0x101   :  { %v2439_v33 = vpop.f32.mrb[0].mxu0 }
 0x102   :  { %v2440_v34 = vpop.f32.mrb[1].mxu0  ;;  %v367_v36 = vpop.f32.mrb[0].mxu1 }
 0x103   :  { %v2441_v37 = vadd.f32 %v2440_v34, %v2439_v33  ;;  %v2442_v38 = vpop.f32.mrb[2].mxu0  ;;  %v2517_v39 = vpop.f32.mrb[1].mxu1 }
 0x104   :  { %v2443_v40 = vpop.f32.mrb[3].mxu0  ;;  %v370_v41 = vpop.f32.mrb[2].mxu1 }
 0x105   :  { %v328_v42 = vadd.f32 %v2441_v37, %v2307_v35  ;;  %v2518_v43 = vpop.f32.mrb[3].mxu1  ;;  %v2784_v35 = vmov 1326507024  }
 0x107   :  { %v368_v44 = vadd.f32 %v367_v36, %v328_v42 }
 0x109   :  { %v373_v45 = vmax.f32 %v368_v44, 0.0 }
 0x10b   :  { %v374_v46 = vpack.c.bf16 %v373_v45, %v373_v45 }
 0x10d   :  { %2524 = vmatmul.mubr.msk.bf16.vlgmr.msra.gmra.mrb[4].mxu0 %vm397_vm2, %v374_v46 }
 0x10e   :  { %2539 = vmatprep.mubr.msk.bf16.mxu0 %vm2778_vm0, %v2777_v1  ;;  %2536 = vmatpush3.bf16.msra.mxu0 %v2715_v49 }
 0x10f   :  { %2537 = vmatprep.subr.bf16.mxu0 %v2777_v1 }
 0x112   :  { %2538 = vmatpush3.bf16.msra.mxu0 %v543_v59 }
 0x113   :  { %2563 = vmatprep.subr.bf16.mxu0 %v2777_v1 }
 0x1e0   :  { %v439_v51 = vpop.f32.mrb[4].mxu0 }
 0x1e1   :  { %v440_v52 = vadd.f32 %v2335_v50, %v439_v51  ;;  %v2525_v53 = vpop.f32.mrb[5].mxu0 }
 0x1e2   :  { %v442_v54 = vpop.f32.mrb[6].mxu0 }
 0x1e3   :  { %v445_v55 = vmax.f32 %v440_v52, 0.0  ;;  %v2526_v56 = vpop.f32.mrb[7].mxu0 }
 0x1e5   :  { %v446_v57 = vpack.c.bf16 %v445_v55, %v445_v55 }
 0x1e7   :  { %2532 = vmatmul.mubr.msk.bf16.vlgmr.msra.gmra.mrb[4].mxu1 %vm397_vm2, %v446_v57 }
 0x1e8   :  { %2559 = vmatprep.mubr.msk.bf16.mxu1 %vm2778_vm0, %v2777_v1 }
 0x2ba   :  { %v509_v61 = vpop.f32.mrb[4].mxu1 }
 0x2bb   :  { %v510_v62 = vadd.f32 %v2339_v60, %v509_v61  ;;  %v2533_v63 = vpop.f32.mrb[5].mxu1 }
 0x2bc   :  { %v512_v0 = vpop.f32.mrb[6].mxu1 }
 0x2bd   :  { %v515_v2 = vmax.f32 %v510_v62, 0.0  ;;  %v2534_v3 = vpop.f32.mrb[7].mxu1 }
 0x2bf   :  { %v516_v4 = vpack.c.bf16 %v515_v2, %v515_v2 }
 0x2c1   :  { %2540 = vmatmul.mubr.msk.bf16.vlgmr.msra.gmra.mrb[8].mxu0 %vm397_vm2, %v516_v4 }
 0x2c2   :  { %2567 = vmatprep.mubr.msk.bf16.mxu0 %vm2778_vm0, %v2777_v1 }
 0x394   :  { %v579_v6 = vpop.f32.mrb[8].mxu0 }
 0x395   :  { %v3070_v7 = vadd.f32 %v2343_v5, %v579_v6  ;;  %v2541_v8 = vpop.f32.mrb[9].mxu0 }
 0x396   :  { %v582_v9 = vpop.f32.mrb[10].mxu0 }
 0x397   :  { %v2542_v10 = vpop.f32.mrb[11].mxu0  ;;  %v588_v11 = vand.u32 2139095040, %v3070_v7  ;;  %v585_v15 = vand.u32 2147483647, %v3070_v7  ;;  %vm587_vm10 = vcmp.lt.s32.totalorder %v3070_v7, 0  ;;  %vm677_vm15 = vweird.f32 %v3070_v7 }
 0x399   :  { %v589_v12 = vshrl.u32 %v588_v11, 23  ;;  %v592_v18 = vand.u32 8388607, %v585_v15  ;;  %vm586_vm11 = vcmp.le.f32.partialorder %v585_v15, 0.7853982 }
 0x39b   :  { %v2347_v13 = vadd.s32 4294967169, %v589_v12  ;;  %v593_v37 = vor.u32 8388608, %v592_v18 }
 0x39d   :  { %v595_v14 = vadd.s32 1, %v2347_v13  ;;  %v633_v51 = vshll.u32 %v593_v37, 8 }
 0x39f   :  { %vm596_vm3 = vcmp.gt.s32.totalorder %v595_v14, 0 }
 0x3a0   :  { %v597_v16 = vsel %vm596_vm3, %v595_v14, 0 }
 0x3a1   :  { %v599_v17 = vand.u32 31, %v597_v16  ;;  %v598_v20 = vshrl.u32 %v597_v16, 5 }
 0x3a3   :  { %v600_v19 = vsub.s32 32, %v599_v17  ;;  %v602_v22 = vshll.u32 %v2779_v21, %v599_v17  ;;  %v605_v24 = vshll.u32 %v2780_v23, %v599_v17  ;;  %v608_v28 = vshll.u32 %v2781_v26, %v599_v17 }
 0x3a4   :  { %v611_v31 = vshll.u32 %v2782_v29, %v599_v17  ;;  %v614_v34 = vshll.u32 %v2783_v32, %v599_v17  ;;  %vm617_vm4 = vcmp.lt.s32.totalorder %v598_v20, 1  ;;  %vm620_vm5 = vcmp.lt.s32.totalorder %v598_v20, 4 }
 0x3a5   :  { %v603_v25 = vshrl.u32 %v2780_v23, %v600_v19  ;;  %v606_v27 = vshrl.u32 %v2781_v26, %v600_v19  ;;  %v609_v30 = vshrl.u32 %v2782_v29, %v600_v19  ;;  %v612_v33 = vshrl.u32 %v2783_v32, %v600_v19 }
 0x3a6   :  { %v615_v36 = vshrl.u32 %v2784_v35, %v600_v19  ;;  %v601_v46 = vshrl.u32 %v2779_v21, %v600_v19  ;;  %vm619_vm6 = vcmp.lt.s32.totalorder %v598_v20, 3  ;;  %vm618_vm7 = vcmp.lt.s32.totalorder %v598_v20, 2 }
 0x3a7   :  { %v604_v38 = vor.u32 %v603_v25, %v602_v22  ;;  %v607_v39 = vor.u32 %v606_v27, %v605_v24  ;;  %v610_v40 = vor.u32 %v609_v30, %v608_v28  ;;  %v613_v41 = vor.u32 %v612_v33, %v611_v31 }
 0x3a8   :  { %v616_v42 = vor.u32 %v615_v36, %v614_v34 }
 0x3a9   :  { %v622_v43 = vsel %vm620_vm5, %v610_v40, 2102212464  ;;  %v625_v44 = vsel %vm617_vm4, %v604_v38, %v607_v39  ;;  %v629_v45 = vsel %vm617_vm4, %v607_v39, %v610_v40  ;;  %v626_v47 = vsel %vm620_vm5, %v613_v41, 920167782 }
 0x3aa   :  { %v630_v48 = vsel %vm620_vm5, %v616_v42, 1326507024  ;;  %v627_v49 = vsel %vm619_vm6, %v610_v40, %v626_v47  ;;  %v621_v52 = vsel %vm617_vm4, %v601_v46, %v604_v38  ;;  %v623_v53 = vsel %vm619_vm6, %v607_v39, %v622_v43 }
 0x3ab   :  { %v631_v50 = vsel %vm619_vm6, %v613_v41, %v630_v48  ;;  %v628_v54 = vsel %vm618_vm7, %v625_v44, %v627_v49  ;;  %v624_v60 = vsel %vm618_vm7, %v621_v52, %v623_v53 }
 0x3ac   :  { %v632_v55 = vsel %vm618_vm7, %v629_v45, %v631_v50  ;;  %v3090_v58 = vmul.u32.u64.low %v633_v51, %v628_v54  ;;  %v3091_v59 = vmul.u32.u64.high %v633_v51, %v628_v54, %v3090_v58  ;;  %v640_v62 = vmul.u32 %v633_v51, %v624_v60 }
 0x3ad   :  { %v3087_v56 = vmul.u32.u64.low %v633_v51, %v632_v55  ;;  %v3088_v57 = vmul.u32.u64.high %v633_v51, %v632_v55, %v3087_v56 }
 0x3ae   :  { %v643_v61 = vadd.s32 1, %v3091_v59 }
 0x3af   :  { %vm642_vm8 = vc.u32 %v3088_v57, %v3090_v58  ;;  %v641_v12 = vadd.s32 %v3090_v58, %v3088_v57 }
 0x3b0   :  { %v644_v63 = vsel %vm642_vm8, %v643_v61, %v3091_v59 }
 0x3b1   :  { %v645_v0 = vadd.s32 %v644_v63, %v640_v62 }
 0x3b3   :  { %v646_v2 = vadd.s32 536870912, %v645_v0 }
 0x3b5   :  { %v647_v3 = vshrl.u32 %v646_v2, 30 }
 0x3b7   :  { %v648_v4 = vshll.u32 %v647_v3, 30  ;;  %v671_v28 = vsub.s32 4, %v647_v3 }
 0x3b9   :  { %v649_v5 = vsub.s32 %v645_v0, %v648_v4  ;;  %v672_v33 = vsel %vm587_vm10, %v671_v28, %v647_v3 }
 0x3ba   :  { %v674_v36 = vsel %vm586_vm11, 0, %v672_v33 }
 0x3bb   :  { %v651_v6 = vsub.s32 0, %v649_v5  ;;  %v678_v37 = vadd.s32 3, %v674_v36 }
 0x3bd   :  { %v2348_v8 = vmin.u32 %v651_v6, %v649_v5  ;;  %v679_v38 = vand.u32 3, %v678_v37 }
 0x3bf   :  { %v653_v9 = vclz %v2348_v8  ;;  %vm684_vm12 = vcmp.eq.s32.totalorder %v679_v38, 2  ;;  %vm681_vm13 = vcmp.eq.s32.totalorder %v679_v38, 0  ;;  %vm680_vm14 = vcmp.lt.s32.totalorder %v679_v38, 2 }
 0x3c1   :  { %v2349_v10 = vadd.s32 4294967294, %v653_v9 }
 0x3c3   :  { %vm2350_vm9 = vcmp.lt.s32.totalorder %v2349_v10, 0 }
 0x3c4   :  { %v656_v11 = vsel %vm2350_vm9, 0, %v2349_v10 }
 0x3c5   :  { %v657_v13 = vsub.s32 32, %v656_v11  ;;  %v661_v14 = vsub.s32 4294967266, %v656_v11  ;;  %v658_v16 = vshll.u32 %v649_v5, %v656_v11 }
 0x3c7   :  { %v659_v17 = vshrl.u32 %v641_v12, %v657_v13  ;;  %v662_v18 = vadd.s32 127, %v661_v14 }
 0x3c9   :  { %v660_v19 = vor.u32 %v659_v17, %v658_v16  ;;  %v663_v20 = vshll.u32 %v662_v18, 23 }
 0x3cb   :  { %v664_v22 = vor.u32 4788187, %v663_v20  ;;  %v667_v25 = vcvt.s32.f32 %v660_v19 }
 0x3cd   :  { %v665_v24 = vand.u32 2147483647, %v664_v22 }
 0x3cf   :  { %v668_v27 = vmul.f32 %v667_v25, %v665_v24 }
 0x3d1   :  { %v669_v30 = vxor.u32 2147483648, %v668_v27 }
 0x3d3   :  { %v670_v31 = vsel %vm587_vm10, %v669_v30, %v668_v27 }
 0x3d4   :  { %v673_v34 = vsel %vm586_vm11, %v3070_v7, %v670_v31 }
 0x3d5   :  { %2745 = vcosq.f32 %v673_v34 }
 0x3d6   :  { %2747 = vsinq.f32 %v673_v34 }
 0x3df   :  { %v2746_v39 = vpop.eup %2745 }
 0x3e0   :  { %v2748_v40 = vpop.eup %2747  ;;  %v685_v41 = vxor.u32 2147483648, %v2746_v39 }
 0x3e1   :  { %v682_v42 = vxor.u32 2147483648, %v2748_v40 }
 0x3e2   :  { %v686_v43 = vsel %vm684_vm12, %v685_v41, %v2748_v40 }
 0x3e3   :  { %v683_v44 = vsel %vm681_vm13, %v2746_v39, %v682_v42 }
 0x3e4   :  { %v687_v15 = vsel %vm680_vm14, %v683_v44, %v686_v43 }
 0x3e5   :  { %v688_v45 = vsel %vm677_vm15, nan, %v687_v15 }
 0x3e6   :  { %v689_v46 = vmul.f32 0.4905, %v688_v45 }
 0x3e8   :  { %691 = vrot.lane.b32.xlu0 %v689_v46, %s2785_s27 }
 0x45a   :  { %v692_v47 = vpop.permute.xlu0 %691 }
 0x45b   :  { %v3104_v48 = vsub.f32 %v3070_v7, %v692_v47 }
 0x45d   :  { %v695_v49 = vmul.f32 0.05, %v3104_v48 }
 0x45f   :  { %697 = vrot.lane.b32.xlu0 %v695_v49, %s2786_s2 }
 0x4d1   :  { %v698_v50 = vpop.permute.xlu0 %697 }
 0x4d2   :  { %v3109_v51 = vadd.f32 %v698_v50, %v3070_v7 }
 0x4d4   :  { %v704_v52 = vand.u32 2139095040, %v3109_v51  ;;  %v701_v56 = vand.u32 2147483647, %v3109_v51  ;;  %vm703_vm10 = vcmp.lt.s32.totalorder %v3109_v51, 0  ;;  %vm793_vm15 = vweird.f32 %v3109_v51 }
 0x4d6   :  { %v705_v53 = vshrl.u32 %v704_v52, 23  ;;  %v708_v59 = vand.u32 8388607, %v701_v56  ;;  %vm702_vm11 = vcmp.le.f32.partialorder %v701_v56, 0.7853982 }
 0x4d8   :  { %v2351_v54 = vadd.s32 4294967169, %v705_v53  ;;  %v709_v10 = vor.u32 8388608, %v708_v59 }
 0x4da   :  { %v711_v55 = vadd.s32 1, %v2351_v54  ;;  %v749_v28 = vshll.u32 %v709_v10, 8 }
 0x4dc   :  { %vm712_vm3 = vcmp.gt.s32.totalorder %v711_v55, 0 }
 0x4dd   :  { %v713_v57 = vsel %vm712_vm3, %v711_v55, 0 }
 0x4de   :  { %v715_v58 = vand.u32 31, %v713_v57  ;;  %v714_v61 = vshrl.u32 %v713_v57, 5 }
 0x4e0   :  { %v716_v60 = vsub.s32 32, %v715_v58  ;;  %v718_v62 = vshll.u32 %v2779_v21, %v715_v58  ;;  %v721_v63 = vshll.u32 %v2780_v23, %v715_v58  ;;  %v724_v3 = vshll.u32 %v2781_v26, %v715_v58 }
 0x4e1   :  { %v727_v5 = vshll.u32 %v2782_v29, %v715_v58  ;;  %v730_v8 = vshll.u32 %v2783_v32, %v715_v58  ;;  %vm733_vm4 = vcmp.lt.s32.totalorder %v714_v61, 1  ;;  %vm736_vm5 = vcmp.lt.s32.totalorder %v714_v61, 4 }
 0x4e2   :  { %v719_v0 = vshrl.u32 %v2780_v23, %v716_v60  ;;  %v722_v2 = vshrl.u32 %v2781_v26, %v716_v60  ;;  %v725_v4 = vshrl.u32 %v2782_v29, %v716_v60  ;;  %v728_v6 = vshrl.u32 %v2783_v32, %v716_v60 }
 0x4e3   :  { %v731_v9 = vshrl.u32 %v2784_v35, %v716_v60  ;;  %v717_v20 = vshrl.u32 %v2779_v21, %v716_v60  ;;  %vm735_vm6 = vcmp.lt.s32.totalorder %v714_v61, 3  ;;  %vm734_vm7 = vcmp.lt.s32.totalorder %v714_v61, 2 }
 0x4e4   :  { %v720_v11 = vor.u32 %v719_v0, %v718_v62  ;;  %v723_v12 = vor.u32 %v722_v2, %v721_v63  ;;  %v726_v13 = vor.u32 %v725_v4, %v724_v3  ;;  %v729_v14 = vor.u32 %v728_v6, %v727_v5 }
 0x4e5   :  { %v732_v16 = vor.u32 %v731_v9, %v730_v8 }
 0x4e6   :  { %v738_v17 = vsel %vm736_vm5, %v726_v13, 2102212464  ;;  %v741_v18 = vsel %vm733_vm4, %v720_v11, %v723_v12  ;;  %v745_v19 = vsel %vm733_vm4, %v723_v12, %v726_v13  ;;  %v742_v22 = vsel %vm736_vm5, %v729_v14, 920167782 }
 0x4e7   :  { %v746_v24 = vsel %vm736_vm5, %v732_v16, 1326507024  ;;  %v743_v25 = vsel %vm735_vm6, %v726_v13, %v742_v22  ;;  %v737_v30 = vsel %vm733_vm4, %v717_v20, %v720_v11  ;;  %v739_v31 = vsel %vm735_vm6, %v723_v12, %v738_v17 }
 0x4e8   :  { %v747_v27 = vsel %vm735_vm6, %v729_v14, %v746_v24  ;;  %v744_v33 = vsel %vm734_vm7, %v741_v18, %v743_v25  ;;  %v740_v40 = vsel %vm734_vm7, %v737_v30, %v739_v31 }
 0x4e9   :  { %v748_v34 = vsel %vm734_vm7, %v745_v19, %v747_v27  ;;  %v3129_v38 = vmul.u32.u64.low %v749_v28, %v744_v33  ;;  %v3130_v39 = vmul.u32.u64.high %v749_v28, %v744_v33, %v3129_v38  ;;  %v756_v42 = vmul.u32 %v749_v28, %v740_v40 }
 0x4ea   :  { %v3126_v36 = vmul.u32.u64.low %v749_v28, %v748_v34  ;;  %v3127_v37 = vmul.u32.u64.high %v749_v28, %v748_v34, %v3126_v36 }
 0x4eb   :  { %v759_v41 = vadd.s32 1, %v3130_v39 }
 0x4ec   :  { %vm758_vm8 = vc.u32 %v3127_v37, %v3129_v38  ;;  %v757_v55 = vadd.s32 %v3129_v38, %v3127_v37 }
 0x4ed   :  { %v760_v43 = vsel %vm758_vm8, %v759_v41, %v3130_v39 }
 0x4ee   :  { %v761_v44 = vadd.s32 %v760_v43, %v756_v42 }
 0x4f0   :  { %v762_v15 = vadd.s32 536870912, %v761_v44 }
 0x4f2   :  { %v763_v45 = vshrl.u32 %v762_v15, 30 }
 0x4f4   :  { %v764_v46 = vshll.u32 %v763_v45, 30  ;;  %v787_v5 = vsub.s32 4, %v763_v45 }
 0x4f6   :  { %v765_v47 = vsub.s32 %v761_v44, %v764_v46  ;;  %v788_v9 = vsel %vm703_vm10, %v787_v5, %v763_v45 }
 0x4f7   :  { %v790_v11 = vsel %vm702_vm11, 0, %v788_v9 }
 0x4f8   :  { %v767_v49 = vsub.s32 0, %v765_v47  ;;  %v794_v12 = vadd.s32 3, %v790_v11 }
 0x4fa   :  { %v2352_v50 = vmin.u32 %v767_v49, %v765_v47  ;;  %v795_v13 = vand.u32 3, %v794_v12 }
 0x4fc   :  { %v769_v52 = vclz %v2352_v50  ;;  %vm800_vm12 = vcmp.eq.s32.totalorder %v795_v13, 2  ;;  %vm797_vm13 = vcmp.eq.s32.totalorder %v795_v13, 0  ;;  %vm796_vm14 = vcmp.lt.s32.totalorder %v795_v13, 2 }
 0x4fe   :  { %v2353_v53 = vadd.s32 4294967294, %v769_v52 }
 0x500   :  { %vm2354_vm9 = vcmp.lt.s32.totalorder %v2353_v53, 0 }
 0x501   :  { %v772_v54 = vsel %vm2354_vm9, 0, %v2353_v53 }
 0x502   :  { %v773_v57 = vsub.s32 32, %v772_v54  ;;  %v777_v58 = vsub.s32 4294967266, %v772_v54  ;;  %v774_v59 = vshll.u32 %v765_v47, %v772_v54 }
 0x504   :  { %v775_v60 = vshrl.u32 %v757_v55, %v773_v57  ;;  %v778_v61 = vadd.s32 127, %v777_v58 }
 0x506   :  { %v776_v62 = vor.u32 %v775_v60, %v774_v59  ;;  %v779_v63 = vshll.u32 %v778_v61, 23 }
 0x508   :  { %v780_v0 = vor.u32 4788187, %v779_v63  ;;  %v783_v3 = vcvt.s32.f32 %v776_v62 }
 0x50a   :  { %v781_v2 = vand.u32 2147483647, %v780_v0 }
 0x50c   :  { %v784_v4 = vmul.f32 %v783_v3, %v781_v2 }
 0x50e   :  { %v785_v6 = vxor.u32 2147483648, %v784_v4 }
 0x510   :  { %v786_v8 = vsel %vm703_vm10, %v785_v6, %v784_v4 }
 0x511   :  { %v789_v10 = vsel %vm702_vm11, %v3109_v51, %v786_v8 }
 0x512   :  { %2749 = vcosq.f32 %v789_v10 }
 0x513   :  { %2751 = vsinq.f32 %v789_v10 }
 0x51c   :  { %v2750_v14 = vpop.eup %2749 }
 0x51d   :  { %v2752_v16 = vpop.eup %2751  ;;  %v801_v17 = vxor.u32 2147483648, %v2750_v14 }
 0x51e   :  { %v798_v18 = vxor.u32 2147483648, %v2752_v16 }
 0x51f   :  { %v802_v19 = vsel %vm800_vm12, %v801_v17, %v2752_v16 }
 0x520   :  { %v799_v20 = vsel %vm797_vm13, %v2750_v14, %v798_v18 }
 0x521   :  { %v803_v56 = vsel %vm796_vm14, %v799_v20, %v802_v19 }
 0x522   :  { %v804_v22 = vsel %vm793_vm15, nan, %v803_v56 }
 0x523   :  { %v805_v24 = vmul.f32 0.4905, %v804_v22 }
 0x525   :  { %807 = vrot.lane.b32.xlu1 %v805_v24, %s2785_s27 }
 0x597   :  { %v808_v25 = vpop.permute.xlu1 %807 }
 0x598   :  { %v3143_v27 = vsub.f32 %v3104_v48, %v808_v25 }
 0x59a   :  { %v811_v28 = vmul.f32 0.05, %v3143_v27 }
 0x59c   :  { %813 = vrot.lane.b32.xlu1 %v811_v28, %s2786_s2 }
 0x60e   :  { %v814_v30 = vpop.permute.xlu1 %813 }
 0x60f   :  { %v3148_v31 = vadd.f32 %v814_v30, %v3109_v51 }
 0x611   :  { %v820_v33 = vand.u32 2139095040, %v3148_v31  ;;  %v817_v38 = vand.u32 2147483647, %v3148_v31  ;;  %vm819_vm10 = vcmp.lt.s32.totalorder %v3148_v31, 0  ;;  %vm909_vm15 = vweird.f32 %v3148_v31 }
 0x613   :  { %v821_v34 = vshrl.u32 %v820_v33, 23  ;;  %v824_v42 = vand.u32 8388607, %v817_v38  ;;  %vm818_vm11 = vcmp.le.f32.partialorder %v817_v38, 0.7853982 }
 0x615   :  { %v2355_v36 = vadd.s32 4294967169, %v821_v34  ;;  %v825_v55 = vor.u32 8388608, %v824_v42 }
 0x617   :  { %v827_v37 = vadd.s32 1, %v2355_v36  ;;  %v865_v8 = vshll.u32 %v825_v55, 8 }
 0x619   :  { %vm828_vm3 = vcmp.gt.s32.totalorder %v827_v37, 0 }
 0x61a   :  { %v829_v39 = vsel %vm828_vm3, %v827_v37, 0 }
 0x61b   :  { %v831_v40 = vand.u32 31, %v829_v39  ;;  %v830_v43 = vshrl.u32 %v829_v39, 5 }
 0x61d   :  { %v832_v41 = vsub.s32 32, %v831_v40  ;;  %v834_v44 = vshll.u32 %v2779_v21, %v831_v40  ;;  %v837_v15 = vshll.u32 %v2780_v23, %v831_v40  ;;  %v840_v47 = vshll.u32 %v2781_v26, %v831_v40 }
 0x61e   :  { %v843_v50 = vshll.u32 %v2782_v29, %v831_v40  ;;  %v846_v53 = vshll.u32 %v2783_v32, %v831_v40  ;;  %vm849_vm4 = vcmp.lt.s32.totalorder %v830_v43, 1  ;;  %vm852_vm5 = vcmp.lt.s32.totalorder %v830_v43, 4 }
 0x61f   :  { %v835_v45 = vshrl.u32 %v2780_v23, %v832_v41  ;;  %v838_v46 = vshrl.u32 %v2781_v26, %v832_v41  ;;  %v841_v49 = vshrl.u32 %v2782_v29, %v832_v41  ;;  %v844_v52 = vshrl.u32 %v2783_v32, %v832_v41 }
 0x620   :  { %v847_v54 = vshrl.u32 %v2784_v35, %v832_v41  ;;  %v833_v2 = vshrl.u32 %v2779_v21, %v832_v41  ;;  %vm851_vm6 = vcmp.lt.s32.totalorder %v830_v43, 3  ;;  %vm850_vm7 = vcmp.lt.s32.totalorder %v830_v43, 2 }
 0x621   :  { %v836_v57 = vor.u32 %v835_v45, %v834_v44  ;;  %v839_v58 = vor.u32 %v838_v46, %v837_v15  ;;  %v842_v59 = vor.u32 %v841_v49, %v840_v47  ;;  %v845_v60 = vor.u32 %v844_v52, %v843_v50 }
 0x622   :  { %v848_v61 = vor.u32 %v847_v54, %v846_v53 }
 0x623   :  { %v854_v62 = vsel %vm852_vm5, %v842_v59, 2102212464  ;;  %v857_v63 = vsel %vm849_vm4, %v836_v57, %v839_v58  ;;  %v861_v0 = vsel %vm849_vm4, %v839_v58, %v842_v59  ;;  %v858_v3 = vsel %vm852_vm5, %v845_v60, 920167782 }
 0x624   :  { %v862_v4 = vsel %vm852_vm5, %v848_v61, 1326507024  ;;  %v859_v5 = vsel %vm851_vm6, %v842_v59, %v858_v3  ;;  %v853_v9 = vsel %vm849_vm4, %v833_v2, %v836_v57  ;;  %v855_v10 = vsel %vm851_vm6, %v839_v58, %v854_v62 }
 0x625   :  { %v863_v6 = vsel %vm851_vm6, %v845_v60, %v862_v4  ;;  %v860_v11 = vsel %vm850_vm7, %v857_v63, %v859_v5  ;;  %v856_v18 = vsel %vm850_vm7, %v853_v9, %v855_v10 }
 0x626   :  { %v864_v12 = vsel %vm850_vm7, %v861_v0, %v863_v6  ;;  %v3168_v16 = vmul.u32.u64.low %v865_v8, %v860_v11  ;;  %v3169_v17 = vmul.u32.u64.high %v865_v8, %v860_v11, %v3168_v16  ;;  %v872_v20 = vmul.u32 %v865_v8, %v856_v18 }
 0x627   :  { %v3165_v13 = vmul.u32.u64.low %v865_v8, %v864_v12  ;;  %v3166_v14 = vmul.u32.u64.high %v865_v8, %v864_v12, %v3165_v13 }
 0x628   :  { %v875_v19 = vadd.s32 1, %v3169_v17 }
 0x629   :  { %vm874_vm8 = vc.u32 %v3166_v14, %v3168_v16  ;;  %v873_v40 = vadd.s32 %v3168_v16, %v3166_v14 }
 0x62a   :  { %v876_v56 = vsel %vm874_vm8, %v875_v19, %v3169_v17 }
 0x62b   :  { %v877_v22 = vadd.s32 %v876_v56, %v872_v20 }
 0x62d   :  { %v878_v24 = vadd.s32 536870912, %v877_v22 }
 0x62f   :  { %v879_v25 = vshrl.u32 %v878_v24, 30 }
 0x631   :  { %v880_v28 = vshll.u32 %v879_v25, 30  ;;  %v903_v53 = vsub.s32 4, %v879_v25 }
 0x633   :  { %v881_v30 = vsub.s32 %v877_v22, %v880_v28  ;;  %v904_v57 = vsel %vm819_vm10, %v903_v53, %v879_v25 }
 0x634   :  { %v906_v59 = vsel %vm818_vm11, 0, %v904_v57 }
 0x635   :  { %v883_v33 = vsub.s32 0, %v881_v30  ;;  %v910_v60 = vadd.s32 3, %v906_v59 }
 0x637   :  { %v2356_v34 = vmin.u32 %v883_v33, %v881_v30  ;;  %v911_v61 = vand.u32 3, %v910_v60 }
 0x639   :  { %v885_v36 = vclz %v2356_v34  ;;  %vm916_vm12 = vcmp.eq.s32.totalorder %v911_v61, 2  ;;  %vm913_vm13 = vcmp.eq.s32.totalorder %v911_v61, 0  ;;  %vm912_vm14 = vcmp.lt.s32.totalorder %v911_v61, 2 }
 0x63b   :  { %v2357_v37 = vadd.s32 4294967294, %v885_v36 }
 0x63d   :  { %vm2358_vm9 = vcmp.lt.s32.totalorder %v2357_v37, 0 }
 0x63e   :  { %v888_v39 = vsel %vm2358_vm9, 0, %v2357_v37 }
 0x63f   :  { %v889_v41 = vsub.s32 32, %v888_v39  ;;  %v893_v42 = vsub.s32 4294967266, %v888_v39  ;;  %v890_v43 = vshll.u32 %v881_v30, %v888_v39 }
 0x641   :  { %v891_v44 = vshrl.u32 %v873_v40, %v889_v41  ;;  %v894_v15 = vadd.s32 127, %v893_v42 }
 0x643   :  { %v892_v45 = vor.u32 %v891_v44, %v890_v43  ;;  %v895_v46 = vshll.u32 %v894_v15, 23 }
 0x645   :  { %v896_v47 = vor.u32 4788187, %v895_v46  ;;  %v899_v50 = vcvt.s32.f32 %v892_v45 }
 0x647   :  { %v897_v49 = vand.u32 2147483647, %v896_v47 }
 0x649   :  { %v900_v52 = vmul.f32 %v899_v50, %v897_v49 }
 0x64b   :  { %v901_v54 = vxor.u32 2147483648, %v900_v52 }
 0x64d   :  { %v902_v55 = vsel %vm819_vm10, %v901_v54, %v900_v52 }
 0x64e   :  { %v905_v58 = vsel %vm818_vm11, %v3148_v31, %v902_v55 }
 0x64f   :  { %2753 = vcosq.f32 %v905_v58 }
 0x650   :  { %2755 = vsinq.f32 %v905_v58 }
 0x659   :  { %v2754_v62 = vpop.eup %2753 }
 0x65a   :  { %v2756_v63 = vpop.eup %2755  ;;  %v917_v0 = vxor.u32 2147483648, %v2754_v62 }
 0x65b   :  { %v914_v2 = vxor.u32 2147483648, %v2756_v63 }
 0x65c   :  { %v918_v3 = vsel %vm916_vm12, %v917_v0, %v2756_v63 }
 0x65d   :  { %v915_v4 = vsel %vm913_vm13, %v2754_v62, %v914_v2 }
 0x65e   :  { %v919_v38 = vsel %vm912_vm14, %v915_v4, %v918_v3 }
 0x65f   :  { %v920_v5 = vsel %vm909_vm15, nan, %v919_v38 }
 0x660   :  { %v921_v6 = vmul.f32 0.4905, %v920_v5 }
 0x662   :  { %923 = vrot.lane.b32.xlu0 %v921_v6, %s2785_s27 }
 0x6d4   :  { %v924_v8 = vpop.permute.xlu0 %923 }
 0x6d5   :  { %v3182_v9 = vsub.f32 %v3143_v27, %v924_v8 }
 0x6d7   :  { %v927_v10 = vmul.f32 0.05, %v3182_v9 }
 0x6d9   :  { %929 = vrot.lane.b32.xlu1 %v927_v10, %s2786_s2 }
 0x74b   :  { %v930_v11 = vpop.permute.xlu1 %929 }
 0x74c   :  { %v3187_v12 = vadd.f32 %v930_v11, %v3148_v31 }
 0x74e   :  { %v936_v13 = vand.u32 2139095040, %v3187_v12  ;;  %v933_v18 = vand.u32 2147483647, %v3187_v12  ;;  %vm935_vm10 = vcmp.lt.s32.totalorder %v3187_v12, 0  ;;  %vm1025_vm15 = vweird.f32 %v3187_v12 }
 0x750   :  { %v937_v14 = vshrl.u32 %v936_v13, 23  ;;  %v940_v22 = vand.u32 8388607, %v933_v18  ;;  %vm934_vm11 = vcmp.le.f32.partialorder %v933_v18, 0.7853982 }
 0x752   :  { %v2359_v16 = vadd.s32 4294967169, %v937_v14  ;;  %v941_v42 = vor.u32 8388608, %v940_v22 }
 0x754   :  { %v943_v17 = vadd.s32 1, %v2359_v16  ;;  %v981_v58 = vshll.u32 %v941_v42, 8 }
 0x756   :  { %vm944_vm3 = vcmp.gt.s32.totalorder %v943_v17, 0 }
 0x757   :  { %v945_v19 = vsel %vm944_vm3, %v943_v17, 0 }
 0x758   :  { %v947_v20 = vand.u32 31, %v945_v19  ;;  %v946_v24 = vshrl.u32 %v945_v19, 5 }
 0x75a   :  { %v948_v56 = vsub.s32 32, %v947_v20  ;;  %v950_v25 = vshll.u32 %v2779_v21, %v947_v20  ;;  %v953_v28 = vshll.u32 %v2780_v23, %v947_v20  ;;  %v956_v34 = vshll.u32 %v2781_v26, %v947_v20 }
 0x75b   :  { %v959_v37 = vshll.u32 %v2782_v29, %v947_v20  ;;  %v962_v40 = vshll.u32 %v2783_v32, %v947_v20  ;;  %vm965_vm4 = vcmp.lt.s32.totalorder %v946_v24, 1  ;;  %vm968_vm5 = vcmp.lt.s32.totalorder %v946_v24, 4 }
 0x75c   :  { %v951_v30 = vshrl.u32 %v2780_v23, %v948_v56  ;;  %v954_v33 = vshrl.u32 %v2781_v26, %v948_v56  ;;  %v957_v36 = vshrl.u32 %v2782_v29, %v948_v56  ;;  %v960_v39 = vshrl.u32 %v2783_v32, %v948_v56 }
 0x75d   :  { %v963_v41 = vshrl.u32 %v2784_v35, %v948_v56  ;;  %v949_v52 = vshrl.u32 %v2779_v21, %v948_v56  ;;  %vm967_vm6 = vcmp.lt.s32.totalorder %v946_v24, 3  ;;  %vm966_vm7 = vcmp.lt.s32.totalorder %v946_v24, 2 }
 0x75e   :  { %v952_v43 = vor.u32 %v951_v30, %v950_v25  ;;  %v955_v44 = vor.u32 %v954_v33, %v953_v28  ;;  %v958_v15 = vor.u32 %v957_v36, %v956_v34  ;;  %v961_v45 = vor.u32 %v960_v39, %v959_v37 }
 0x75f   :  { %v964_v46 = vor.u32 %v963_v41, %v962_v40 }
 0x760   :  { %v970_v47 = vsel %vm968_vm5, %v958_v15, 2102212464  ;;  %v973_v49 = vsel %vm965_vm4, %v952_v43, %v955_v44  ;;  %v977_v50 = vsel %vm965_vm4, %v955_v44, %v958_v15  ;;  %v974_v53 = vsel %vm968_vm5, %v961_v45, 920167782 }
 0x761   :  { %v978_v54 = vsel %vm968_vm5, %v964_v46, 1326507024  ;;  %v975_v55 = vsel %vm967_vm6, %v958_v15, %v974_v53  ;;  %v969_v59 = vsel %vm965_vm4, %v949_v52, %v952_v43  ;;  %v971_v60 = vsel %vm967_vm6, %v955_v44, %v970_v47 }
 0x762   :  { %v979_v57 = vsel %vm967_vm6, %v961_v45, %v978_v54  ;;  %v976_v61 = vsel %vm966_vm7, %v973_v49, %v975_v55  ;;  %v972_v4 = vsel %vm966_vm7, %v969_v59, %v971_v60 }
 0x763   :  { %v980_v62 = vsel %vm966_vm7, %v977_v50, %v979_v57  ;;  %v3207_v2 = vmul.u32.u64.low %v981_v58, %v976_v61  ;;  %v3208_v3 = vmul.u32.u64.high %v981_v58, %v976_v61, %v3207_v2  ;;  %v988_v5 = vmul.u32 %v981_v58, %v972_v4 }
 0x764   :  { %v3204_v63 = vmul.u32.u64.low %v981_v58, %v980_v62  ;;  %v3205_v0 = vmul.u32.u64.high %v981_v58, %v980_v62, %v3204_v63 }
 0x765   :  { %v991_v38 = vadd.s32 1, %v3208_v3 }
 0x766   :  { %vm990_vm8 = vc.u32 %v3205_v0, %v3207_v2  ;;  %v989_v22 = vadd.s32 %v3207_v2, %v3205_v0 }
 0x767   :  { %v992_v6 = vsel %vm990_vm8, %v991_v38, %v3208_v3 }
 0x768   :  { %v993_v8 = vadd.s32 %v992_v6, %v988_v5 }
 0x76a   :  { %v994_v10 = vadd.s32 536870912, %v993_v8 }
 0x76c   :  { %v995_v11 = vshrl.u32 %v994_v10, 30 }
 0x76e   :  { %v996_v13 = vshll.u32 %v995_v11, 30  ;;  %v1019_v42 = vsub.s32 4, %v995_v11 }
 0x770   :  { %v997_v14 = vsub.s32 %v993_v8, %v996_v13  ;;  %v1020_v15 = vsel %vm935_vm10, %v1019_v42, %v995_v11 }
 0x771   :  { %v1022_v46 = vsel %vm934_vm11, 0, %v1020_v15 }
 0x772   :  { %v999_v16 = vsub.s32 0, %v997_v14  ;;  %v1026_v47 = vadd.s32 3, %v1022_v46 }
 0x774   :  { %v2360_v17 = vmin.u32 %v999_v16, %v997_v14  ;;  %v1027_v49 = vand.u32 3, %v1026_v47 }
 0x776   :  { %v1001_v19 = vclz %v2360_v17  ;;  %vm1032_vm12 = vcmp.eq.s32.totalorder %v1027_v49, 2  ;;  %vm1029_vm13 = vcmp.eq.s32.totalorder %v1027_v49, 0  ;;  %vm1028_vm14 = vcmp.lt.s32.totalorder %v1027_v49, 2 }
 0x778   :  { %v2361_v20 = vadd.s32 4294967294, %v1001_v19 }
 0x77a   :  { %vm2362_vm9 = vcmp.lt.s32.totalorder %v2361_v20, 0 }
 0x77b   :  { %v1004_v56 = vsel %vm2362_vm9, 0, %v2361_v20 }
 0x77c   :  { %v1005_v24 = vsub.s32 32, %v1004_v56  ;;  %v1009_v25 = vsub.s32 4294967266, %v1004_v56  ;;  %v1006_v28 = vshll.u32 %v997_v14, %v1004_v56 }
 0x77e   :  { %v1007_v30 = vshrl.u32 %v989_v22, %v1005_v24  ;;  %v1010_v33 = vadd.s32 127, %v1009_v25 }
 0x780   :  { %v1008_v34 = vor.u32 %v1007_v30, %v1006_v28  ;;  %v1011_v36 = vshll.u32 %v1010_v33, 23 }
 0x782   :  { %v1012_v37 = vor.u32 4788187, %v1011_v36  ;;  %v1015_v40 = vcvt.s32.f32 %v1008_v34 }
 0x784   :  { %v1013_v39 = vand.u32 2147483647, %v1012_v37 }
 0x786   :  { %v1016_v41 = vmul.f32 %v1015_v40, %v1013_v39 }
 0x788   :  { %v1017_v43 = vxor.u32 2147483648, %v1016_v41 }
 0x78a   :  { %v1018_v44 = vsel %vm935_vm10, %v1017_v43, %v1016_v41 }
 0x78b   :  { %v1021_v45 = vsel %vm934_vm11, %v3187_v12, %v1018_v44 }
 0x78c   :  { %2757 = vcosq.f32 %v1021_v45 }
 0x78d   :  { %2759 = vsinq.f32 %v1021_v45 }
 0x796   :  { %v2758_v50 = vpop.eup %2757 }
 0x797   :  { %v2760_v52 = vpop.eup %2759  ;;  %v1033_v53 = vxor.u32 2147483648, %v2758_v50 }
 0x798   :  { %v1030_v54 = vxor.u32 2147483648, %v2760_v52 }
 0x799   :  { %v1034_v55 = vsel %vm1032_vm12, %v1033_v53, %v2760_v52 }
 0x79a   :  { %v1031_v57 = vsel %vm1029_vm13, %v2758_v50, %v1030_v54 }
 0x79b   :  { %v1035_v18 = vsel %vm1028_vm14, %v1031_v57, %v1034_v55 }
 0x79c   :  { %v1036_v58 = vsel %vm1025_vm15, nan, %v1035_v18 }
 0x79d   :  { %v1037_v59 = vmul.f32 0.4905, %v1036_v58 }
 0x79f   :  { %1039 = vrot.lane.b32.xlu0 %v1037_v59, %s2785_s27 }
 0x811   :  { %v1040_v60 = vpop.permute.xlu0 %1039 }
 0x812   :  { %v3221_v61 = vsub.f32 %v3182_v9, %v1040_v60 }
 0x814   :  { %v1043_v62 = vmul.f32 0.05, %v3221_v61 }
 0x816   :  { %1045 = vrot.lane.b32.xlu1 %v1043_v62, %s2786_s2 }
 0x888   :  { %v1046_v63 = vpop.permute.xlu1 %1045 }
 0x889   :  { %v3226_v0 = vadd.f32 %v1046_v63, %v3187_v12 }
 0x88b   :  { %v1052_v2 = vand.u32 2139095040, %v3226_v0  ;;  %v1049_v5 = vand.u32 2147483647, %v3226_v0  ;;  %vm1051_vm10 = vcmp.lt.s32.totalorder %v3226_v0, 0  ;;  %vm1141_vm15 = vweird.f32 %v3226_v0 }
 0x88d   :  { %v1053_v3 = vshrl.u32 %v1052_v2, 23  ;;  %v1056_v11 = vand.u32 8388607, %v1049_v5  ;;  %vm1050_vm11 = vcmp.le.f32.partialorder %v1049_v5, 0.7853982 }
 0x88f   :  { %v2363_v4 = vadd.s32 4294967169, %v1053_v3  ;;  %v1057_v30 = vor.u32 8388608, %v1056_v11 }
 0x891   :  { %v1059_v38 = vadd.s32 1, %v2363_v4  ;;  %v1097_v47 = vshll.u32 %v1057_v30, 8 }
 0x893   :  { %vm1060_vm3 = vcmp.gt.s32.totalorder %v1059_v38, 0 }
 0x894   :  { %v1061_v6 = vsel %vm1060_vm3, %v1059_v38, 0 }
 0x895   :  { %v1063_v8 = vand.u32 31, %v1061_v6  ;;  %v1062_v13 = vshrl.u32 %v1061_v6, 5 }
 0x897   :  { %v1064_v10 = vsub.s32 32, %v1063_v8  ;;  %v1066_v14 = vshll.u32 %v2779_v21, %v1063_v8  ;;  %v1069_v16 = vshll.u32 %v2780_v23, %v1063_v8  ;;  %v1072_v20 = vshll.u32 %v2781_v26, %v1063_v8 }
 0x898   :  { %v1075_v22 = vshll.u32 %v2782_v29, %v1063_v8  ;;  %v1078_v25 = vshll.u32 %v2783_v32, %v1063_v8  ;;  %vm1081_vm4 = vcmp.lt.s32.totalorder %v1062_v13, 1  ;;  %vm1084_vm5 = vcmp.lt.s32.totalorder %v1062_v13, 4 }
 0x899   :  { %v1067_v17 = vshrl.u32 %v2780_v23, %v1064_v10  ;;  %v1070_v19 = vshrl.u32 %v2781_v26, %v1064_v10  ;;  %v1073_v56 = vshrl.u32 %v2782_v29, %v1064_v10  ;;  %v1076_v24 = vshrl.u32 %v2783_v32, %v1064_v10 }
 0x89a   :  { %v1079_v28 = vshrl.u32 %v2784_v35, %v1064_v10  ;;  %v1065_v43 = vshrl.u32 %v2779_v21, %v1064_v10  ;;  %vm1083_vm6 = vcmp.lt.s32.totalorder %v1062_v13, 3  ;;  %vm1082_vm7 = vcmp.lt.s32.totalorder %v1062_v13, 2 }
 0x89b   :  { %v1068_v33 = vor.u32 %v1067_v17, %v1066_v14  ;;  %v1071_v34 = vor.u32 %v1070_v19, %v1069_v16  ;;  %v1074_v36 = vor.u32 %v1073_v56, %v1072_v20  ;;  %v1077_v37 = vor.u32 %v1076_v24, %v1075_v22 }
 0x89c   :  { %v1080_v39 = vor.u32 %v1079_v28, %v1078_v25 }
 0x89d   :  { %v1086_v40 = vsel %vm1084_vm5, %v1074_v36, 2102212464  ;;  %v1089_v41 = vsel %vm1081_vm4, %v1068_v33, %v1071_v34  ;;  %v1093_v42 = vsel %vm1081_vm4, %v1071_v34, %v1074_v36  ;;  %v1090_v44 = vsel %vm1084_vm5, %v1077_v37, 920167782 }
 0x89e   :  { %v1094_v15 = vsel %vm1084_vm5, %v1080_v39, 1326507024  ;;  %v1091_v45 = vsel %vm1083_vm6, %v1074_v36, %v1090_v44  ;;  %v1085_v49 = vsel %vm1081_vm4, %v1065_v43, %v1068_v33  ;;  %v1087_v50 = vsel %vm1083_vm6, %v1071_v34, %v1086_v40 }
 0x89f   :  { %v1095_v46 = vsel %vm1083_vm6, %v1077_v37, %v1094_v15  ;;  %v1092_v52 = vsel %vm1082_vm7, %v1089_v41, %v1091_v45  ;;  %v1088_v58 = vsel %vm1082_vm7, %v1085_v49, %v1087_v50 }
 0x8a0   :  { %v1096_v53 = vsel %vm1082_vm7, %v1093_v42, %v1095_v46  ;;  %v3246_v57 = vmul.u32.u64.low %v1097_v47, %v1092_v52  ;;  %v3247_v18 = vmul.u32.u64.high %v1097_v47, %v1092_v52, %v3246_v57  ;;  %v1104_v60 = vmul.u32 %v1097_v47, %v1088_v58 }
 0x8a1   :  { %v3243_v54 = vmul.u32.u64.low %v1097_v47, %v1096_v53  ;;  %v3244_v55 = vmul.u32.u64.high %v1097_v47, %v1096_v53, %v3243_v54 }
 0x8a2   :  { %v1107_v59 = vadd.s32 1, %v3247_v18 }
 0x8a3   :  { %vm1106_vm8 = vc.u32 %v3244_v55, %v3246_v57  ;;  %v1105_v14 = vadd.s32 %v3246_v57, %v3244_v55 }
 0x8a4   :  { %v1108_v62 = vsel %vm1106_vm8, %v1107_v59, %v3247_v18 }
 0x8a5   :  { %v1109_v63 = vadd.s32 %v1108_v62, %v1104_v60 }
 0x8a7   :  { %v1110_v2 = vadd.s32 536870912, %v1109_v63 }
 0x8a9   :  { %v1111_v3 = vshrl.u32 %v1110_v2, 30 }
 0x8ab   :  { %v1112_v4 = vshll.u32 %v1111_v3, 30  ;;  %v1135_v34 = vsub.s32 4, %v1111_v3 }
 0x8ad   :  { %v1113_v38 = vsub.s32 %v1109_v63, %v1112_v4  ;;  %v1136_v39 = vsel %vm1051_vm10, %v1135_v34, %v1111_v3 }
 0x8ae   :  { %v1138_v41 = vsel %vm1050_vm11, 0, %v1136_v39 }
 0x8af   :  { %v1115_v6 = vsub.s32 0, %v1113_v38  ;;  %v1142_v42 = vadd.s32 3, %v1138_v41 }
 0x8b1   :  { %v2364_v8 = vmin.u32 %v1115_v6, %v1113_v38  ;;  %v1143_v43 = vand.u32 3, %v1142_v42 }
 0x8b3   :  { %v1117_v10 = vclz %v2364_v8  ;;  %vm1148_vm12 = vcmp.eq.s32.totalorder %v1143_v43, 2  ;;  %vm1145_vm13 = vcmp.eq.s32.totalorder %v1143_v43, 0  ;;  %vm1144_vm14 = vcmp.lt.s32.totalorder %v1143_v43, 2 }
 0x8b5   :  { %v2365_v11 = vadd.s32 4294967294, %v1117_v10 }
 0x8b7   :  { %vm2366_vm9 = vcmp.lt.s32.totalorder %v2365_v11, 0 }
 0x8b8   :  { %v1120_v13 = vsel %vm2366_vm9, 0, %v2365_v11 }
 0x8b9   :  { %v1121_v16 = vsub.s32 32, %v1120_v13  ;;  %v1125_v17 = vsub.s32 4294967266, %v1120_v13  ;;  %v1122_v19 = vshll.u32 %v1113_v38, %v1120_v13 }
 0x8bb   :  { %v1123_v20 = vshrl.u32 %v1105_v14, %v1121_v16  ;;  %v1126_v56 = vadd.s32 127, %v1125_v17 }
 0x8bd   :  { %v1124_v22 = vor.u32 %v1123_v20, %v1122_v19  ;;  %v1127_v24 = vshll.u32 %v1126_v56, 23 }
 0x8bf   :  { %v1128_v25 = vor.u32 4788187, %v1127_v24  ;;  %v1131_v30 = vcvt.s32.f32 %v1124_v22 }
 0x8c1   :  { %v1129_v28 = vand.u32 2147483647, %v1128_v25 }
 0x8c3   :  { %v1132_v33 = vmul.f32 %v1131_v30, %v1129_v28 }
 0x8c5   :  { %v1133_v36 = vxor.u32 2147483648, %v1132_v33 }
 0x8c7   :  { %v1134_v37 = vsel %vm1051_vm10, %v1133_v36, %v1132_v33 }
 0x8c8   :  { %v1137_v40 = vsel %vm1050_vm11, %v3226_v0, %v1134_v37 }
 0x8c9   :  { %2761 = vcosq.f32 %v1137_v40 }
 0x8ca   :  { %2763 = vsinq.f32 %v1137_v40 }
 0x8d3   :  { %v2762_v44 = vpop.eup %2761 }
 0x8d4   :  { %v2764_v15 = vpop.eup %2763  ;;  %v1149_v45 = vxor.u32 2147483648, %v2762_v44 }
 0x8d5   :  { %v1146_v46 = vxor.u32 2147483648, %v2764_v15 }
 0x8d6   :  { %v1150_v47 = vsel %vm1148_vm12, %v1149_v45, %v2764_v15 }
 0x8d7   :  { %v1147_v49 = vsel %vm1145_vm13, %v2762_v44, %v1146_v46 }
 0x8d8   :  { %v1151_v5 = vsel %vm1144_vm14, %v1147_v49, %v1150_v47 }
 0x8d9   :  { %v1152_v50 = vsel %vm1141_vm15, nan, %v1151_v5 }
 0x8da   :  { %v1153_v52 = vmul.f32 0.4905, %v1152_v50 }
 0x8dc   :  { %1155 = vrot.lane.b32.xlu0 %v1153_v52, %s2785_s27 }
 0x94e   :  { %v1156_v53 = vpop.permute.xlu0 %1155 }
 0x94f   :  { %v3260_v54 = vsub.f32 %v3221_v61, %v1156_v53 }
 0x951   :  { %v1159_v55 = vmul.f32 0.05, %v3260_v54 }
 0x953   :  { %1161 = vrot.lane.b32.xlu1 %v1159_v55, %s2786_s2 }
 0x9c5   :  { %v1162_v57 = vpop.permute.xlu1 %1161 }
 0x9c6   :  { %v3265_v18 = vadd.f32 %v1162_v57, %v3226_v0 }
 0x9c8   :  { %v1168_v58 = vand.u32 2139095040, %v3265_v18  ;;  %v1165_v63 = vand.u32 2147483647, %v3265_v18  ;;  %vm1167_vm10 = vcmp.lt.s32.totalorder %v3265_v18, 0  ;;  %vm1257_vm15 = vweird.f32 %v3265_v18 }
 0x9ca   :  { %v1169_v59 = vshrl.u32 %v1168_v58, 23  ;;  %v1172_v38 = vand.u32 8388607, %v1165_v63  ;;  %vm1166_vm11 = vcmp.le.f32.partialorder %v1165_v63, 0.7853982 }
 0x9cc   :  { %v2367_v60 = vadd.s32 4294967169, %v1169_v59  ;;  %v1173_v22 = vor.u32 8388608, %v1172_v38 }
 0x9ce   :  { %v1175_v62 = vadd.s32 1, %v2367_v60  ;;  %v1213_v44 = vshll.u32 %v1173_v22, 8 }
 0x9d0   :  { %vm1176_vm3 = vcmp.gt.s32.totalorder %v1175_v62, 0 }
 0x9d1   :  { %v1177_v2 = vsel %vm1176_vm3, %v1175_v62, 0 }
 0x9d2   :  { %v1179_v3 = vand.u32 31, %v1177_v2  ;;  %v1178_v6 = vshrl.u32 %v1177_v2, 5 }
 0x9d4   :  { %v1180_v4 = vsub.s32 32, %v1179_v3  ;;  %v1182_v8 = vshll.u32 %v2779_v21, %v1179_v3  ;;  %v1185_v10 = vshll.u32 %v2780_v23, %v1179_v3  ;;  %v1188_v14 = vshll.u32 %v2781_v26, %v1179_v3 }
 0x9d5   :  { %v1191_v17 = vshll.u32 %v2782_v29, %v1179_v3  ;;  %v1194_v20 = vshll.u32 %v2783_v32, %v1179_v3  ;;  %vm1197_vm4 = vcmp.lt.s32.totalorder %v1178_v6, 1  ;;  %vm1200_vm5 = vcmp.lt.s32.totalorder %v1178_v6, 4 }
 0x9d6   :  { %v1183_v11 = vshrl.u32 %v2780_v23, %v1180_v4  ;;  %v1186_v13 = vshrl.u32 %v2781_v26, %v1180_v4  ;;  %v1189_v16 = vshrl.u32 %v2782_v29, %v1180_v4  ;;  %v1192_v19 = vshrl.u32 %v2783_v32, %v1180_v4 }
 0x9d7   :  { %v1195_v56 = vshrl.u32 %v2784_v35, %v1180_v4  ;;  %v1181_v39 = vshrl.u32 %v2779_v21, %v1180_v4  ;;  %vm1199_vm6 = vcmp.lt.s32.totalorder %v1178_v6, 3  ;;  %vm1198_vm7 = vcmp.lt.s32.totalorder %v1178_v6, 2 }
 0x9d8   :  { %v1184_v24 = vor.u32 %v1183_v11, %v1182_v8  ;;  %v1187_v25 = vor.u32 %v1186_v13, %v1185_v10  ;;  %v1190_v28 = vor.u32 %v1189_v16, %v1188_v14  ;;  %v1193_v30 = vor.u32 %v1192_v19, %v1191_v17 }
 0x9d9   :  { %v1196_v33 = vor.u32 %v1195_v56, %v1194_v20 }
 0x9da   :  { %v1202_v34 = vsel %vm1200_vm5, %v1190_v28, 2102212464  ;;  %v1205_v36 = vsel %vm1197_vm4, %v1184_v24, %v1187_v25  ;;  %v1209_v37 = vsel %vm1197_vm4, %v1187_v25, %v1190_v28  ;;  %v1206_v40 = vsel %vm1200_vm5, %v1193_v30, 920167782 }
 0x9db   :  { %v1210_v41 = vsel %vm1200_vm5, %v1196_v33, 1326507024  ;;  %v1207_v42 = vsel %vm1199_vm6, %v1190_v28, %v1206_v40  ;;  %v1201_v15 = vsel %vm1197_vm4, %v1181_v39, %v1184_v24  ;;  %v1203_v45 = vsel %vm1199_vm6, %v1187_v25, %v1202_v34 }
 0x9dc   :  { %v1211_v43 = vsel %vm1199_vm6, %v1193_v30, %v1210_v41  ;;  %v1208_v46 = vsel %vm1198_vm7, %v1205_v36, %v1207_v42  ;;  %v1204_v53 = vsel %vm1198_vm7, %v1201_v15, %v1203_v45 }
 0x9dd   :  { %v1212_v47 = vsel %vm1198_vm7, %v1209_v37, %v1211_v43  ;;  %v3285_v50 = vmul.u32.u64.low %v1213_v44, %v1208_v46  ;;  %v3286_v52 = vmul.u32.u64.high %v1213_v44, %v1208_v46, %v3285_v50  ;;  %v1220_v57 = vmul.u32 %v1213_v44, %v1204_v53 }
 0x9de   :  { %v3282_v49 = vmul.u32.u64.low %v1213_v44, %v1212_v47  ;;  %v3283_v5 = vmul.u32.u64.high %v1213_v44, %v1212_v47, %v3282_v49 }
 0x9df   :  { %v1223_v55 = vadd.s32 1, %v3286_v52 }
 0x9e0   :  { %vm1222_vm8 = vc.u32 %v3283_v5, %v3285_v50  ;;  %v1221_v11 = vadd.s32 %v3285_v50, %v3283_v5 }
 0x9e1   :  { %v1224_v58 = vsel %vm1222_vm8, %v1223_v55, %v3286_v52 }
 0x9e2   :  { %v1225_v59 = vadd.s32 %v1224_v58, %v1220_v57 }
 0x9e4   :  { %v1226_v60 = vadd.s32 536870912, %v1225_v59 }
 0x9e6   :  { %v1227_v62 = vshrl.u32 %v1226_v60, 30 }
 0x9e8   :  { %v1228_v2 = vshll.u32 %v1227_v62, 30  ;;  %v1251_v30 = vsub.s32 4, %v1227_v62 }
 0x9ea   :  { %v1229_v3 = vsub.s32 %v1225_v59, %v1228_v2  ;;  %v1252_v36 = vsel %vm1167_vm10, %v1251_v30, %v1227_v62 }
 0x9eb   :  { %v1254_v39 = vsel %vm1166_vm11, 0, %v1252_v36 }
 0x9ec   :  { %v1231_v4 = vsub.s32 0, %v1229_v3  ;;  %v1258_v40 = vadd.s32 3, %v1254_v39 }
 0x9ee   :  { %v2368_v38 = vmin.u32 %v1231_v4, %v1229_v3  ;;  %v1259_v41 = vand.u32 3, %v1258_v40 }
 0x9f0   :  { %v1233_v6 = vclz %v2368_v38  ;;  %vm1264_vm12 = vcmp.eq.s32.totalorder %v1259_v41, 2  ;;  %vm1261_vm13 = vcmp.eq.s32.totalorder %v1259_v41, 0  ;;  %vm1260_vm14 = vcmp.lt.s32.totalorder %v1259_v41, 2 }
 0x9f2   :  { %v2369_v8 = vadd.s32 4294967294, %v1233_v6 }
 0x9f4   :  { %vm2370_vm9 = vcmp.lt.s32.totalorder %v2369_v8, 0 }
 0x9f5   :  { %v1236_v10 = vsel %vm2370_vm9, 0, %v2369_v8 }
 0x9f6   :  { %v1237_v13 = vsub.s32 32, %v1236_v10  ;;  %v1241_v14 = vsub.s32 4294967266, %v1236_v10  ;;  %v1238_v16 = vshll.u32 %v1229_v3, %v1236_v10 }
 0x9f8   :  { %v1239_v17 = vshrl.u32 %v1221_v11, %v1237_v13  ;;  %v1242_v19 = vadd.s32 127, %v1241_v14 }
 0x9fa   :  { %v1240_v20 = vor.u32 %v1239_v17, %v1238_v16  ;;  %v1243_v56 = vshll.u32 %v1242_v19, 23 }
 0x9fc   :  { %v1244_v22 = vor.u32 4788187, %v1243_v56  ;;  %v1247_v25 = vcvt.s32.f32 %v1240_v20 }
 0x9fe   :  { %v1245_v24 = vand.u32 2147483647, %v1244_v22 }
 0xa00   :  { %v1248_v28 = vmul.f32 %v1247_v25, %v1245_v24 }
 0xa02   :  { %v1249_v33 = vxor.u32 2147483648, %v1248_v28 }
 0xa04   :  { %v1250_v34 = vsel %vm1167_vm10, %v1249_v33, %v1248_v28 }
 0xa05   :  { %v1253_v37 = vsel %vm1166_vm11, %v3265_v18, %v1250_v34 }
 0xa06   :  { %2765 = vcosq.f32 %v1253_v37 }
 0xa07   :  { %2767 = vsinq.f32 %v1253_v37 }
 0xa10   :  { %v2766_v42 = vpop.eup %2765 }
 0xa11   :  { %v2768_v43 = vpop.eup %2767  ;;  %v1265_v44 = vxor.u32 2147483648, %v2766_v42 }
 0xa12   :  { %v1262_v15 = vxor.u32 2147483648, %v2768_v43 }
 0xa13   :  { %v1266_v45 = vsel %vm1264_vm12, %v1265_v44, %v2768_v43 }
 0xa14   :  { %v1263_v46 = vsel %vm1261_vm13, %v2766_v42, %v1262_v15 }
 0xa15   :  { %v1267_v63 = vsel %vm1260_vm14, %v1263_v46, %v1266_v45 }
 0xa16   :  { %v1268_v47 = vsel %vm1257_vm15, nan, %v1267_v63 }
 0xa17   :  { %v1269_v49 = vmul.f32 0.4905, %v1268_v47 }
 0xa19   :  { %1271 = vrot.lane.b32.xlu0 %v1269_v49, %s2785_s27 }
 0xa8b   :  { %v1272_v5 = vpop.permute.xlu0 %1271 }
 0xa8c   :  { %v3299_v50 = vsub.f32 %v3260_v54, %v1272_v5 }
 0xa8e   :  { %v1275_v52 = vmul.f32 0.05, %v3299_v50 }
 0xa90   :  { %1277 = vrot.lane.b32.xlu1 %v1275_v52, %s2786_s2 }
 0xb02   :  { %v1278_v53 = vpop.permute.xlu1 %1277 }
 0xb03   :  { %v3304_v55 = vadd.f32 %v1278_v53, %v3265_v18 }
 0xb05   :  { %v1284_v57 = vand.u32 2139095040, %v3304_v55  ;;  %v1281_v62 = vand.u32 2147483647, %v3304_v55  ;;  %vm1283_vm10 = vcmp.lt.s32.totalorder %v3304_v55, 0  ;;  %vm1373_vm15 = vweird.f32 %v3304_v55 }
 0xb07   :  { %v1285_v58 = vshrl.u32 %v1284_v57, 23  ;;  %v1288_v38 = vand.u32 8388607, %v1281_v62  ;;  %vm1282_vm11 = vcmp.le.f32.partialorder %v1281_v62, 0.7853982 }
 0xb09   :  { %v2371_v59 = vadd.s32 4294967169, %v1285_v58  ;;  %v1289_v22 = vor.u32 8388608, %v1288_v38 }
 0xb0b   :  { %v1291_v60 = vadd.s32 1, %v2371_v59  ;;  %v1329_v44 = vshll.u32 %v1289_v22, 8 }
 0xb0d   :  { %vm1292_vm3 = vcmp.gt.s32.totalorder %v1291_v60, 0 }
 0xb0e   :  { %v1293_v2 = vsel %vm1292_vm3, %v1291_v60, 0 }
 0xb0f   :  { %v1295_v3 = vand.u32 31, %v1293_v2  ;;  %v1294_v6 = vshrl.u32 %v1293_v2, 5 }
 0xb11   :  { %v1296_v4 = vsub.s32 32, %v1295_v3  ;;  %v1298_v8 = vshll.u32 %v2779_v21, %v1295_v3  ;;  %v1301_v10 = vshll.u32 %v2780_v23, %v1295_v3  ;;  %v1304_v14 = vshll.u32 %v2781_v26, %v1295_v3 }
 0xb12   :  { %v1307_v17 = vshll.u32 %v2782_v29, %v1295_v3  ;;  %v1310_v20 = vshll.u32 %v2783_v32, %v1295_v3  ;;  %vm1313_vm4 = vcmp.lt.s32.totalorder %v1294_v6, 1  ;;  %vm1316_vm5 = vcmp.lt.s32.totalorder %v1294_v6, 4 }
 0xb13   :  { %v1299_v11 = vshrl.u32 %v2780_v23, %v1296_v4  ;;  %v1302_v13 = vshrl.u32 %v2781_v26, %v1296_v4  ;;  %v1305_v16 = vshrl.u32 %v2782_v29, %v1296_v4  ;;  %v1308_v19 = vshrl.u32 %v2783_v32, %v1296_v4 }
 0xb14   :  { %v1311_v56 = vshrl.u32 %v2784_v35, %v1296_v4  ;;  %v1297_v39 = vshrl.u32 %v2779_v21, %v1296_v4  ;;  %vm1315_vm6 = vcmp.lt.s32.totalorder %v1294_v6, 3  ;;  %vm1314_vm7 = vcmp.lt.s32.totalorder %v1294_v6, 2 }
 0xb15   :  { %v1300_v24 = vor.u32 %v1299_v11, %v1298_v8  ;;  %v1303_v25 = vor.u32 %v1302_v13, %v1301_v10  ;;  %v1306_v28 = vor.u32 %v1305_v16, %v1304_v14  ;;  %v1309_v30 = vor.u32 %v1308_v19, %v1307_v17 }
 0xb16   :  { %v1312_v33 = vor.u32 %v1311_v56, %v1310_v20 }
 0xb17   :  { %v1318_v34 = vsel %vm1316_vm5, %v1306_v28, 2102212464  ;;  %v1321_v36 = vsel %vm1313_vm4, %v1300_v24, %v1303_v25  ;;  %v1325_v37 = vsel %vm1313_vm4, %v1303_v25, %v1306_v28  ;;  %v1322_v40 = vsel %vm1316_vm5, %v1309_v30, 920167782 }
 0xb18   :  { %v1326_v41 = vsel %vm1316_vm5, %v1312_v33, 1326507024  ;;  %v1323_v42 = vsel %vm1315_vm6, %v1306_v28, %v1322_v40  ;;  %v1317_v15 = vsel %vm1313_vm4, %v1297_v39, %v1300_v24  ;;  %v1319_v45 = vsel %vm1315_vm6, %v1303_v25, %v1318_v34 }
 0xb19   :  { %v1327_v43 = vsel %vm1315_vm6, %v1309_v30, %v1326_v41  ;;  %v1324_v46 = vsel %vm1314_vm7, %v1321_v36, %v1323_v42  ;;  %v1320_v53 = vsel %vm1314_vm7, %v1317_v15, %v1319_v45 }
 0xb1a   :  { %v1328_v63 = vsel %vm1314_vm7, %v1325_v37, %v1327_v43  ;;  %v3324_v5 = vmul.u32.u64.low %v1329_v44, %v1324_v46  ;;  %v3325_v52 = vmul.u32.u64.high %v1329_v44, %v1324_v46, %v3324_v5  ;;  %v1336_v58 = vmul.u32 %v1329_v44, %v1320_v53 }
 0xb1b   :  { %v3321_v47 = vmul.u32.u64.low %v1329_v44, %v1328_v63  ;;  %v3322_v49 = vmul.u32.u64.high %v1329_v44, %v1328_v63, %v3321_v47 }
 0xb1c   :  { %v1339_v57 = vadd.s32 1, %v3325_v52 }
 0xb1d   :  { %vm1338_vm8 = vc.u32 %v3322_v49, %v3324_v5  ;;  %v1337_v14 = vadd.s32 %v3324_v5, %v3322_v49 }
 0xb1e   :  { %v1340_v59 = vsel %vm1338_vm8, %v1339_v57, %v3325_v52 }
 0xb1f   :  { %v1341_v60 = vadd.s32 %v1340_v59, %v1336_v58 }
 0xb21   :  { %v1342_v2 = vadd.s32 536870912, %v1341_v60 }
 0xb23   :  { %v1343_v3 = vshrl.u32 %v1342_v2, 30 }
 0xb25   :  { %v1344_v4 = vshll.u32 %v1343_v3, 30  ;;  %v1367_v34 = vsub.s32 4, %v1343_v3 }
 0xb27   :  { %v1345_v38 = vsub.s32 %v1341_v60, %v1344_v4  ;;  %v1368_v39 = vsel %vm1283_vm10, %v1367_v34, %v1343_v3 }
 0xb28   :  { %v1370_v41 = vsel %vm1282_vm11, 0, %v1368_v39 }
 0xb29   :  { %v1347_v6 = vsub.s32 0, %v1345_v38  ;;  %v1374_v42 = vadd.s32 3, %v1370_v41 }
 0xb2b   :  { %v2372_v8 = vmin.u32 %v1347_v6, %v1345_v38  ;;  %v1375_v43 = vand.u32 3, %v1374_v42 }
 0xb2d   :  { %v1349_v10 = vclz %v2372_v8  ;;  %vm1380_vm12 = vcmp.eq.s32.totalorder %v1375_v43, 2  ;;  %vm1377_vm13 = vcmp.eq.s32.totalorder %v1375_v43, 0  ;;  %vm1376_vm14 = vcmp.lt.s32.totalorder %v1375_v43, 2 }
 0xb2f   :  { %v2373_v11 = vadd.s32 4294967294, %v1349_v10 }
 0xb31   :  { %vm2374_vm9 = vcmp.lt.s32.totalorder %v2373_v11, 0 }
 0xb32   :  { %v1352_v13 = vsel %vm2374_vm9, 0, %v2373_v11 }
 0xb33   :  { %v1353_v16 = vsub.s32 32, %v1352_v13  ;;  %v1357_v17 = vsub.s32 4294967266, %v1352_v13  ;;  %v1354_v19 = vshll.u32 %v1345_v38, %v1352_v13 }
 0xb35   :  { %v1355_v20 = vshrl.u32 %v1337_v14, %v1353_v16  ;;  %v1358_v56 = vadd.s32 127, %v1357_v17 }
 0xb37   :  { %v1356_v22 = vor.u32 %v1355_v20, %v1354_v19  ;;  %v1359_v24 = vshll.u32 %v1358_v56, 23 }
 0xb39   :  { %v1360_v25 = vor.u32 4788187, %v1359_v24  ;;  %v1363_v30 = vcvt.s32.f32 %v1356_v22 }
 0xb3b   :  { %v1361_v28 = vand.u32 2147483647, %v1360_v25 }
 0xb3d   :  { %v1364_v33 = vmul.f32 %v1363_v30, %v1361_v28 }
 0xb3f   :  { %v1365_v36 = vxor.u32 2147483648, %v1364_v33 }
 0xb41   :  { %v1366_v37 = vsel %vm1283_vm10, %v1365_v36, %v1364_v33 }
 0xb42   :  { %v1369_v40 = vsel %vm1282_vm11, %v3304_v55, %v1366_v37 }
 0xb43   :  { %2769 = vcosq.f32 %v1369_v40 }
 0xb44   :  { %2771 = vsinq.f32 %v1369_v40 }
 0xb4d   :  { %v2770_v44 = vpop.eup %2769 }
 0xb4e   :  { %v2772_v15 = vpop.eup %2771  ;;  %v1381_v45 = vxor.u32 2147483648, %v2770_v44 }
 0xb4f   :  { %v1378_v46 = vxor.u32 2147483648, %v2772_v15 }
 0xb50   :  { %v1382_v63 = vsel %vm1380_vm12, %v1381_v45, %v2772_v15 }
 0xb51   :  { %v1379_v47 = vsel %vm1377_vm13, %v2770_v44, %v1378_v46 }
 0xb52   :  { %v1383_v62 = vsel %vm1376_vm14, %v1379_v47, %v1382_v63 }
 0xb53   :  { %v1384_v49 = vsel %vm1373_vm15, nan, %v1383_v62 }
 0xb54   :  { %v1385_v5 = vmul.f32 0.4905, %v1384_v49 }
 0xb56   :  { %1387 = vrot.lane.b32.xlu0 %v1385_v5, %s2785_s27 }
 0xbc8   :  { %v1388_v52 = vpop.permute.xlu0 %1387 }
 0xbc9   :  { %v3338_v53 = vsub.f32 %v3299_v50, %v1388_v52 }
 0xbcb   :  { %v1391_v57 = vmul.f32 0.05, %v3338_v53 }
 0xbcd   :  { %1393 = vrot.lane.b32.xlu1 %v1391_v57, %s2786_s2 }
 0xc3f   :  { %v1394_v58 = vpop.permute.xlu1 %1393 }
 0xc40   :  { %v3343_v59 = vadd.f32 %v1394_v58, %v3304_v55 }
 0xc42   :  { %v1400_v60 = vand.u32 2139095040, %v3343_v59  ;;  %v1397_v38 = vand.u32 2147483647, %v3343_v59  ;;  %vm1399_vm10 = vcmp.lt.s32.totalorder %v3343_v59, 0  ;;  %vm1489_vm15 = vweird.f32 %v3343_v59 }
 0xc44   :  { %v1401_v2 = vshrl.u32 %v1400_v60, 23  ;;  %v1404_v11 = vand.u32 8388607, %v1397_v38  ;;  %vm1398_vm11 = vcmp.le.f32.partialorder %v1397_v38, 0.7853982 }
 0xc46   :  { %v2375_v3 = vadd.s32 4294967169, %v1401_v2  ;;  %v1405_v30 = vor.u32 8388608, %v1404_v11 }
 0xc48   :  { %v1407_v4 = vadd.s32 1, %v2375_v3 }
 0xc4a   :  { %vm1408_vm3 = vcmp.gt.s32.totalorder %v1407_v4, 0 }
 0xc4b   :  { %v1409_v6 = vsel %vm1408_vm3, %v1407_v4, 0  ;;  %vm1573_vm3 = vcmask 7168  }
 0xc4c   :  { %v1411_v8 = vand.u32 31, %v1409_v6  ;;  %v1410_v13 = vshrl.u32 %v1409_v6, 5 }
 0xc4e   :  { %v1412_v10 = vsub.s32 32, %v1411_v8  ;;  %v1414_v14 = vshll.u32 %v2779_v21, %v1411_v8  ;;  %v1417_v16 = vshll.u32 %v2780_v23, %v1411_v8  ;;  %v1420_v20 = vshll.u32 %v2781_v26, %v1411_v8 }
 0xc4f   :  { %v1423_v22 = vshll.u32 %v2782_v29, %v1411_v8  ;;  %v1426_v25 = vshll.u32 %v2783_v32, %v1411_v8  ;;  %vm1429_vm4 = vcmp.lt.s32.totalorder %v1410_v13, 1  ;;  %vm1432_vm5 = vcmp.lt.s32.totalorder %v1410_v13, 4 }
 0xc50   :  { %v1415_v17 = vshrl.u32 %v2780_v23, %v1412_v10  ;;  %v1418_v19 = vshrl.u32 %v2781_v26, %v1412_v10  ;;  %v1421_v56 = vshrl.u32 %v2782_v29, %v1412_v10  ;;  %v1424_v24 = vshrl.u32 %v2783_v32, %v1412_v10 }
 0xc51   :  { %v1427_v28 = vshrl.u32 %v2784_v35, %v1412_v10  ;;  %v1413_v41 = vshrl.u32 %v2779_v21, %v1412_v10  ;;  %vm1431_vm6 = vcmp.lt.s32.totalorder %v1410_v13, 3  ;;  %vm1430_vm7 = vcmp.lt.s32.totalorder %v1410_v13, 2 }
 0xc52   :  { %v1416_v33 = vor.u32 %v1415_v17, %v1414_v14  ;;  %v1419_v34 = vor.u32 %v1418_v19, %v1417_v16  ;;  %v1422_v36 = vor.u32 %v1421_v56, %v1420_v20  ;;  %v1425_v37 = vor.u32 %v1424_v24, %v1423_v22 }
 0xc53   :  { %v1428_v23 = vor.u32 %v1427_v28, %v1426_v25  ;;  %v1445_v35 = vshll.u32 %v1405_v30, 8 }
 0xc54   :  { %v1434_v39 = vsel %vm1432_vm5, %v1422_v36, 2102212464  ;;  %v1437_v26 = vsel %vm1429_vm4, %v1416_v33, %v1419_v34  ;;  %v1441_v40 = vsel %vm1429_vm4, %v1419_v34, %v1422_v36  ;;  %v1438_v29 = vsel %vm1432_vm5, %v1425_v37, 920167782 }
 0xc55   :  { %v1442_v42 = vsel %vm1432_vm5, %v1428_v23, 1326507024  ;;  %v1439_v32 = vsel %vm1431_vm6, %v1422_v36, %v1438_v29  ;;  %v1433_v44 = vsel %vm1429_vm4, %v1413_v41, %v1416_v33  ;;  %v1435_v15 = vsel %vm1431_vm6, %v1419_v34, %v1434_v39 }
 0xc56   :  { %v1443_v43 = vsel %vm1431_vm6, %v1425_v37, %v1442_v42  ;;  %v1440_v45 = vsel %vm1430_vm7, %v1437_v26, %v1439_v32  ;;  %v1436_v5 = vsel %vm1430_vm7, %v1433_v44, %v1435_v15  ;;  %vm1575_vm4 = vcmask 15360  }
 0xc57   :  { %v1444_v46 = vsel %vm1430_vm7, %v1441_v40, %v1443_v43  ;;  %v3363_v62 = vmul.u32.u64.low %v1445_v35, %v1440_v45  ;;  %v3364_v49 = vmul.u32.u64.high %v1445_v35, %v1440_v45, %v3363_v62  ;;  %v1452_v52 = vmul.u32 %v1445_v35, %v1436_v5 }
 0xc58   :  { %v3360_v63 = vmul.u32.u64.low %v1445_v35, %v1444_v46  ;;  %v3361_v47 = vmul.u32.u64.high %v1445_v35, %v1444_v46, %v3360_v63  ;;  %vm1577_vm5 = vcmask 23552   ;;  %vm1579_vm6 = vcmask 31744  }
 0xc59   :  { %v1455_v21 = vadd.s32 1, %v3364_v49  ;;  %vm1581_vm7 = vcmask 39936  }
 0xc5a   :  { %vm1454_vm8 = vc.u32 %v3361_v47, %v3363_v62  ;;  %v1453_v14 = vadd.s32 %v3363_v62, %v3361_v47 }
 0xc5b   :  { %v1456_v57 = vsel %vm1454_vm8, %v1455_v21, %v3364_v49  ;;  %vm1583_vm8 = vcmask 48128   ;;  %v2719_v21 = vld [vmem:[%s3637_s0 + $0x10] sm:$0xff]  }
 0xc5c   :  { %v1457_v58 = vadd.s32 %v1456_v57, %v1452_v52 }
 0xc5e   :  { %v1458_v60 = vadd.s32 536870912, %v1457_v58 }
 0xc60   :  { %v1459_v2 = vshrl.u32 %v1458_v60, 30 }
 0xc62   :  { %v1460_v3 = vshll.u32 %v1459_v2, 30  ;;  %v1483_v34 = vsub.s32 4, %v1459_v2 }
 0xc64   :  { %v1461_v4 = vsub.s32 %v1457_v58, %v1460_v3  ;;  %v1484_v23 = vsel %vm1399_vm10, %v1483_v34, %v1459_v2  ;;  %v2720_v2 = vld [vmem:[%s3637_s0 + $0x18] sm:$0xff]  }
 0xc65   :  { %v1486_v26 = vsel %vm1398_vm11, 0, %v1484_v23 }
 0xc66   :  { %v1463_v6 = vsub.s32 0, %v1461_v4  ;;  %v1490_v40 = vadd.s32 3, %v1486_v26 }
 0xc68   :  { %v2376_v8 = vmin.u32 %v1463_v6, %v1461_v4  ;;  %v1491_v41 = vand.u32 3, %v1490_v40  ;;  %v2721_v6 = vld [vmem:[%s3637_s0 + $0x20] sm:$0xff]  }
 0xc6a   :  { %v1465_v10 = vclz %v2376_v8  ;;  %vm1496_vm12 = vcmp.eq.s32.totalorder %v1491_v41, 2  ;;  %vm1493_vm13 = vcmp.eq.s32.totalorder %v1491_v41, 0  ;;  %vm1492_vm14 = vcmp.lt.s32.totalorder %v1491_v41, 2 }
 0xc6c   :  { %v2377_v11 = vadd.s32 4294967294, %v1465_v10 }
 0xc6e   :  { %vm2378_vm9 = vcmp.lt.s32.totalorder %v2377_v11, 0 }
 0xc6f   :  { %v1468_v13 = vsel %vm2378_vm9, 0, %v2377_v11  ;;  %vm1585_vm9 = vcmask 56320  }
 0xc70   :  { %v1469_v16 = vsub.s32 32, %v1468_v13  ;;  %v1473_v17 = vsub.s32 4294967266, %v1468_v13  ;;  %v1470_v19 = vshll.u32 %v1461_v4, %v1468_v13 }
 0xc72   :  { %v1471_v20 = vshrl.u32 %v1453_v14, %v1469_v16  ;;  %v1474_v56 = vadd.s32 127, %v1473_v17  ;;  %v2722_v14 = vld [vmem:[%s3637_s0 + $0x28] sm:$0xff]  }
 0xc74   :  { %v1472_v22 = vor.u32 %v1471_v20, %v1470_v19  ;;  %v1475_v24 = vshll.u32 %v1474_v56, 23  ;;  %v2723_v56 = vld [vmem:[%s3637_s0 + $0x30] sm:$0xff]  }
 0xc76   :  { %v1476_v25 = vor.u32 4788187, %v1475_v24  ;;  %v1479_v30 = vcvt.s32.f32 %v1472_v22 }
 0xc78   :  { %v1477_v28 = vand.u32 2147483647, %v1476_v25 }
 0xc7a   :  { %v1480_v33 = vmul.f32 %v1479_v30, %v1477_v28 }
 0xc7c   :  { %v1481_v36 = vxor.u32 2147483648, %v1480_v33 }
 0xc7e   :  { %v1482_v37 = vsel %vm1399_vm10, %v1481_v36, %v1480_v33  ;;  %vm1587_vm10 = vcmask 64512  }
 0xc7f   :  { %v1485_v39 = vsel %vm1398_vm11, %v3343_v59, %v1482_v37  ;;  %vm1589_vm11 = vcmask 72704   ;;  %v2724_v37 = vld [vmem:[%s3637_s0 + $0x38] ss:$0 sps:$4 sm:$0xff]  }
 0xc80   :  { %2773 = vcosq.f32 %v1485_v39 }
 0xc81   :  { %2775 = vsinq.f32 %v1485_v39 }
 0xc8a   :  { %v2774_v29 = vpop.eup %2773 }
 0xc8b   :  { %v2776_v42 = vpop.eup %2775  ;;  %v1497_v32 = vxor.u32 2147483648, %v2774_v29 }
 0xc8c   :  { %v1494_v43 = vxor.u32 2147483648, %v2776_v42 }
 0xc8d   :  { %v1498_v35 = vsel %vm1496_vm12, %v1497_v32, %v2776_v42  ;;  %vm1591_vm12 = vcmask 80896   ;;  %v2725_v42 = vld [vmem:[%s3596_s11] sm:$0xff]  }
 0xc8e   :  { %v1495_v44 = vsel %vm1493_vm13, %v2774_v29, %v1494_v43  ;;  %vm1723_vm13 = vcmask 1043456   ;;  %2564 = vmatpush3.bf16.msra.mxu0 %v2725_v42 }
 0xc8f   :  { %v1499_v38 = vsel %vm1492_vm14, %v1495_v44, %v1498_v35  ;;  %vm1593_vm14 = vcmask 89088   ;;  %v1725_v39 = vsel %vm1723_vm13, %v2724_v37, 0  ;;  %2565 = vmatprep.subr.bf16.mxu0 %v2777_v1 }
 0xc90   :  { %v1500_v15 = vsel %vm1489_vm15, nan, %v1499_v38  ;;  %vm1595_vm15 = vcmask 97280  }
 0xc91   :  { %v1501_v45 = vmul.f32 0.4905, %v1500_v15 }
 0xc93   :  { %1503 = vrot.lane.b32.xlu0 %v1501_v45, %s2785_s27 }
 0xc97   :  { %1604 = vrot.lane.b32.xlu0 %v3299_v50, %s2787_s28 }
 0xc9b   :  { %1611 = vrot.lane.b32.xlu0 %v3343_v59, %s2788_s4 }
 0xc9f   :  { %1618 = vrot.lane.b32.xlu0 %v3070_v7, %s2788_s4 }
 0xd05   :  { %v1504_v46 = vpop.permute.xlu0 %1503 }
 0xd06   :  { %v1506_v63 = vsub.f32 %v3338_v53, %v1504_v46 }
 0xd08   :  { %v1507_v47 = vmul.f32 0.05, %v1506_v63  ;;  %1626 = vrot.lane.b32.xlu0 %v1506_v63, %s2789_s9 }
 0xd0a   :  { %1509 = vrot.lane.b32.xlu1 %v1507_v47, %s2786_s2 }
 0xd0c   :  { %1514 = vrot.lane.b32.xlu0 %v3109_v51, %s2790_s7 }
 0xd0e   :  { %1607 = vrot.lane.b32.xlu1 %v3070_v7, %s2787_s28 }
 0xd10   :  { %1522 = vrot.lane.b32.xlu0 %v3070_v7, %s2790_s7 }
 0xd12   :  { %1615 = vrot.lane.b32.xlu1 %v3338_v53, %s2788_s4 }
 0xd14   :  { %1530 = vrot.lane.b32.xlu0 %v3143_v27, %s2791_s1  ;;  %v1605_v27 = vpop.permute.xlu0 %1604 }
 0xd18   :  { %1537 = vrot.lane.b32.xlu0 %v3187_v12, %s2792_s29  ;;  %v1612_v12 = vpop.permute.xlu0 %1611 }
 0xd1c   :  { %1544 = vrot.lane.b32.xlu0 %v3070_v7, %s2792_s29 }
 0xd20   :  { %1552 = vrot.lane.b32.xlu0 %v3221_v61, %s2793_s3 }
 0xd24   :  { %1559 = vrot.lane.b32.xlu0 %v3265_v18, %s2794_s30  ;;  %v1619_v18 = vpop.permute.xlu0 %1618 }
 0xd28   :  { %1566 = vrot.lane.b32.xlu0 %v3070_v7, %s2794_s30 }
 0xd7c   :  { %v1510_v51 = vpop.permute.xlu1 %1509 }
 0xd7d   :  { %v1512_v50 = vadd.f32 %v1510_v51, %v3343_v59 }
 0xd7f   :  { %1622 = vrot.lane.b32.xlu1 %v1512_v50, %s2789_s9  ;;  %v2726_v50 = vld [vmem:[%s3596_s11 + $0x8] sm:$0x7f]  }
 0xd80   :  { %v1608_v61 = vpop.permute.xlu1 %1607 }
 0xd83   :  { %1629 = vrot.lane.b32.xlu1 %v3070_v7, %s2789_s9 }
 0xd87   :  { %1518 = vrot.lane.b32.xlu1 %v3104_v48, %s2790_s7  ;;  %v1627_v48 = vpop.permute.xlu0 %1626  ;;  %s2796_s7 = smov 16  }
 0xd8b   :  { %1526 = vrot.lane.b32.xlu1 %v3148_v31, %s2791_s1  ;;  %v1632_v31 = vsel %vm1573_vm3, %v1605_v27, %v1608_v61  ;;  %v1515_v59 = vpop.permute.xlu0 %1514  ;;  %v1795_v27 = vsel %vm401_vm1, %v2726_v50, 0  ;;  %v2411_v50 = vld [vmem:[%s3608_s20] ss:$0 sm:$0xff] }
 0xd8c   :  { %2566 = vmatpush3.bf16.msra.mxu0 %v1795_v27 }
 0xd8d   :  { %2571 = vmatprep.subr.bf16.mxu0 %v2777_v1 }
 0xd8f   :  { %1533 = vrot.lane.b32.xlu1 %v3070_v7, %s2791_s1  ;;  %v1523_v58 = vpop.permute.xlu0 %1522 }
 0xd93   :  { %1541 = vrot.lane.b32.xlu1 %v3182_v9, %s2792_s29  ;;  %v1616_v9 = vpop.permute.xlu1 %1615  ;;  %v1531_v8 = vpop.permute.xlu0 %1530 }
 0xd97   :  { %1548 = vrot.lane.b32.xlu1 %v3226_v0, %s2793_s3  ;;  %v2717_v0 = vld [vmem:[%s3637_s0] sm:$0xff]   ;;  %v1538_v19 = vpop.permute.xlu0 %1537 }
 0xd98   :  { %2544 = vmatpush3.bf16.msra.mxu1 %v2717_v0  ;;  %v2727_v0 = vld [vmem:[%s3597_s13] sm:$0xff]  }
 0xd99   :  { %2545 = vmatprep.subr.bf16.mxu1 %v2777_v1 }
 0xd9b   :  { %1555 = vrot.lane.b32.xlu1 %v3070_v7, %s2793_s3  ;;  %v1545_v28 = vpop.permute.xlu0 %1544 }
 0xd9f   :  { %1563 = vrot.lane.b32.xlu1 %v3260_v54, %s2794_s30  ;;  %v1633_v54 = vsel %vm1575_vm4, %v1632_v31, %v1612_v12  ;;  %v1553_v33 = vpop.permute.xlu0 %1552 }
 0xda0   :  { %v1634_v53 = vsel %vm1577_vm5, %v1633_v54, %v1616_v9 }
 0xda1   :  { %v1635_v49 = vsel %vm1579_vm6, %v1634_v53, %v1619_v18  ;;  %v2728_v53 = vld [vmem:[%s3597_s13 + $0x8] sm:$0x7f]  }
 0xda3   :  { %1570 = vrot.lane.b32.xlu1 %v3304_v55, %s2795_s6  ;;  %v2718_v55 = vld [vmem:[%s3637_s0 + $0x8] sm:$0xff]   ;;  %v1560_v26 = vpop.permute.xlu0 %1559  ;;  %s2797_s0 = smov 96  }
 0xda4   :  { %2546 = vmatpush3.bf16.msra.mxu1 %v2718_v55  ;;  %v1865_v55 = vsel %vm401_vm1, %v2728_v53, 0  ;;  %v2415_v53 = vld [vmem:[%s3609_s22] ss:$0 sm:$0xff] }
 0xda5   :  { %2547 = vmatprep.subr.bf16.mxu1 %v2777_v1 }
 0xda7   :  { %v1567_v43 = vpop.permute.xlu0 %1566 }
 0xda8   :  { %2548 = vmatpush3.bf16.msra.mxu1 %v2719_v21 }
 0xda9   :  { %2549 = vmatprep.subr.bf16.mxu1 %v2777_v1 }
 0xdac   :  { %2550 = vmatpush3.bf16.msra.mxu1 %v2720_v2  ;;  %v2730_v2 = vld [vmem:[%s3599_s15 + $0x8] sm:$0x7f]  }
 0xdad   :  { %2551 = vmatprep.subr.bf16.mxu1 %v2777_v1 }
 0xdb0   :  { %2552 = vmatpush3.bf16.msra.mxu1 %v2721_v6 }
 0xdb1   :  { %2553 = vmatprep.subr.bf16.mxu1 %v2777_v1 }
 0xdb4   :  { %2554 = vmatpush3.bf16.msra.mxu1 %v2722_v14 }
 0xdb5   :  { %2555 = vmatprep.subr.bf16.mxu1 %v2777_v1 }
 0xdb8   :  { %2556 = vmatpush3.bf16.msra.mxu1 %v2723_v56  ;;  %v2734_v56 = vld [vmem:[%s3601_s17 + $0x18] sm:$0xff]  }
 0xdb9   :  { %2557 = vmatprep.subr.bf16.mxu1 %v2777_v1 }
 0xdbc   :  { %2558 = vmatpush3.bf16.msra.mxu1 %v1725_v39 }
 0xdbd   :  { %2607 = vmatprep.subr.bf16.mxu1 %v2777_v1 }
 0xdf1   :  { %v1623_v62 = vpop.permute.xlu1 %1622 }
 0xdf2   :  { %v1636_v5 = vsel %vm1581_vm7, %v1635_v49, %v1623_v62 }
 0xdf3   :  { %v1637_v57 = vsel %vm1583_vm8, %v1636_v5, %v1627_v48 }
 0xdf5   :  { %v1630_v52 = vpop.permute.xlu1 %1629 }
 0xdf6   :  { %v1638_v60 = vsel %vm1585_vm9, %v1637_v57, %v1630_v52 }
 0xdf7   :  { %1640 = vrot.lane.b32.xlu0 %v1638_v60, %s2796_s7 }
 0xdf9   :  { %v1519_v3 = vpop.permute.xlu1 %1518 }
 0xdfa   :  { %v1574_v4 = vsel %vm1573_vm3, %v1515_v59, %v1519_v3  ;;  %vm1597_vm3 = vcmask 105472   ;;  %v2389_v59 = vld [vmem:[%s3600_s12] ss:$0 sm:$0xff]  ;;  %v1935_v3 = vsel %vm401_vm1, %v2730_v2, 0 }
 0xdfb   :  { %v1576_v11 = vsel %vm1575_vm4, %v1574_v4, %v1523_v58  ;;  %vm1599_vm4 = vcmask 113664   ;;  %v2729_v58 = vld [vmem:[%s3599_s15] sm:$0xff]  }
 0xdfc   :  { %v2393_v4 = vld [vmem:[%s3602_s14] ss:$0 sm:$0xff] }
 0xdfd   :  { %v1527_v10 = vpop.permute.xlu1 %1526 }
 0xdfe   :  { %v1578_v13 = vsel %vm1577_vm5, %v1576_v11, %v1527_v10  ;;  %vm1601_vm5 = vcmask 121856  }
 0xdff   :  { %v1580_v17 = vsel %vm1579_vm6, %v1578_v13, %v1531_v8  ;;  %vm1643_vm6 = vcmask 130048  }
 0xe01   :  { %v1534_v16 = vpop.permute.xlu1 %1533 }
 0xe02   :  { %v1582_v20 = vsel %vm1581_vm7, %v1580_v17, %v1534_v16  ;;  %vm1649_vm7 = vcmask 785408   ;;  %v2731_v16 = vld [vmem:[%s3601_s17] sm:$0xff]  }
 0xe03   :  { %v1584_v22 = vsel %vm1583_vm8, %v1582_v20, %v1538_v19  ;;  %vm1719_vm8 = vcmask 982016   ;;  %v2732_v19 = vld [vmem:[%s3601_s17 + $0x8] sm:$0xff]   ;;  %v2733_v20 = vld [vmem:[%s3601_s17 + $0x10] sm:$0xff]  }
 0xe05   :  { %v1542_v24 = vpop.permute.xlu1 %1541 }
 0xe06   :  { %v1586_v25 = vsel %vm1585_vm9, %v1584_v22, %v1542_v24  ;;  %v2735_v22 = vld [vmem:[%s3601_s17 + $0x20] sm:$0xff]   ;;  %v2736_v24 = vld [vmem:[%s3601_s17 + $0x28] sm:$0xff]  }
 0xe07   :  { %v1588_v36 = vsel %vm1587_vm10, %v1586_v25, %v1545_v28  ;;  %v2737_v25 = vld [vmem:[%s3601_s17 + $0x30] sm:$0xff]   ;;  %v2738_v28 = vld [vmem:[%s3601_s17 + $0x38] ss:$0 sps:$4 sm:$0xff]  }
 0xe09   :  { %v1549_v30 = vpop.permute.xlu1 %1548 }
 0xe0a   :  { %v1590_v23 = vsel %vm1589_vm11, %v1588_v36, %v1549_v30  ;;  %v2050_v30 = vsel %vm1723_vm13, %v2738_v28, 0 }
 0xe0b   :  { %v1592_v40 = vsel %vm1591_vm12, %v1590_v23, %v1553_v33  ;;  %v2739_v33 = vld [vmem:[%s3603_s19] sm:$0xff]  }
 0xe0d   :  { %v1556_v34 = vpop.permute.xlu1 %1555 }
 0xe0e   :  { %v1594_v29 = vsel %vm1593_vm14, %v1592_v40, %v1556_v34  ;;  %v2397_v34 = vld [vmem:[%s3604_s16] ss:$0 sm:$0xff] }
 0xe0f   :  { %v1596_v32 = vsel %vm1595_vm15, %v1594_v29, %v1560_v26  ;;  %v2740_v29 = vld [vmem:[%s3603_s19 + $0x8] sm:$0x7f]  }
 0xe10   :  { %v2120_v42 = vsel %vm401_vm1, %v2740_v29, 0 }
 0xe11   :  { %v1564_v41 = vpop.permute.xlu1 %1563 }
 0xe12   :  { %v1598_v35 = vsel %vm1597_vm3, %v1596_v32, %v1564_v41  ;;  %v2401_v32 = vld [vmem:[%s3606_s18] ss:$0 sm:$0xff] }
 0xe13   :  { %v1600_v38 = vsel %vm1599_vm4, %v1598_v35, %v1567_v43 }
 0xe15   :  { %v1571_v44 = vpop.permute.xlu1 %1570 }
 0xe16   :  { %v1602_v15 = vsel %vm1601_vm5, %v1600_v38, %v1571_v44 }
 0xe69   :  { %v1641_v45 = vpop.permute.xlu0 %1640 }
 0xe6a   :  { %v1644_v46 = vsel %vm1643_vm6, %v1602_v15, %v1641_v45 }
 0xe6b   :  { %1646 = vrot.lane.b32.xlu1 %v1644_v46, %s2797_s0  ;;  %v2741_v46 = vld [vmem:[%s3605_s21] sm:$0xff]  }
 0xedd   :  { %v1647_v63 = vpop.permute.xlu1 %1646 }
 0xede   :  { %v3453_v47 = vsel %vm1649_vm7, %v3070_v7, %v1647_v63  ;;  %v2379_v7 = vld [vmem:[%s3598_s10] ss:$0 sm:$0xff] }
 0xedf   :  { %v1651_v51 = vpack.c.bf16 %v3453_v47, %v3453_v47 }
 0xee1   :  { %2560 = vmatmul.mubr.msk.bf16.vlgmr.msra.gmra.mrb[8].mxu1 %vm1719_vm8, %v1651_v51 }
 0xee2   :  { %2611 = vmatprep.mubr.msk.bf16.mxu1 %vm2778_vm0, %v2777_v1  ;;  %2608 = vmatpush3.bf16.msra.mxu1 %v2739_v33 }
 0xee3   :  { %2609 = vmatprep.subr.bf16.mxu1 %v2777_v1 }
 0xee6   :  { %2610 = vmatpush3.bf16.msra.mxu1 %v2120_v42 }
 0xee7   :  { %2615 = vmatprep.subr.bf16.mxu1 %v2777_v1 }
 0xfb4   :  { %v1761_v12 = vpop.f32.mrb[8].mxu1 }
 0xfb5   :  { %v1762_v61 = vadd.f32 %v2379_v7, %v1761_v12  ;;  %v2561_v18 = vpop.f32.mrb[9].mxu1 }
 0xfb6   :  { %v1764_v48 = vpop.f32.mrb[10].mxu1 }
 0xfb7   :  { %v1767_v31 = vmax.f32 %v1762_v61, 0.0  ;;  %v2562_v9 = vpop.f32.mrb[11].mxu1 }
 0xfb9   :  { %v1768_v54 = vpack.c.bf16 %v1767_v31, %v1767_v31  ;;  %v2743_v31 = vld [vmem:[%s3607_s23] sm:$0xff]  }
 0xfbb   :  { %2568 = vmatmul.mubr.msk.bf16.vlgmr.msra.gmra.mrb[12].mxu0 %vm397_vm2, %v1768_v54 }
 0xfbc   :  { %2572 = vmatpush3.bf16.msra.mxu0 %v2727_v0  ;;  %2575 = vmatprep.mubr.msk.bf16.mxu0 %vm2778_vm0, %v2777_v1  ;;  %v2744_v0 = vld [vmem:[%s3607_s23 + $0x8] sm:$0x7f]  }
 0xfbd   :  { %2573 = vmatprep.subr.bf16.mxu0 %v2777_v1  ;;  %v2260_v54 = vsel %vm401_vm1, %v2744_v0, 0 }
 0xfc0   :  { %2574 = vmatpush3.bf16.msra.mxu0 %v1865_v55 }
 0xfc1   :  { %2579 = vmatprep.subr.bf16.mxu0 %v2777_v1 }
0x108e   :  { %v1831_v62 = vpop.f32.mrb[12].mxu0 }
0x108f   :  { %v1832_v49 = vadd.f32 %v2389_v59, %v1831_v62  ;;  %v2569_v5 = vpop.f32.mrb[13].mxu0 }
0x1090   :  { %v1834_v21 = vpop.f32.mrb[14].mxu0 }
0x1091   :  { %v1837_v52 = vmax.f32 %v1832_v49, 0.0  ;;  %v2570_v57 = vpop.f32.mrb[15].mxu0 }
0x1093   :  { %v1838_v60 = vpack.c.bf16 %v1837_v52, %v1837_v52 }
0x1095   :  { %2576 = vmatmul.mubr.msk.bf16.vlgmr.msra.gmra.mrb[16].mxu0 %vm397_vm2, %v1838_v60 }
0x1096   :  { %2580 = vmatpush3.bf16.msra.mxu0 %v2729_v58  ;;  %2583 = vmatprep.mubr.msk.bf16.mxu0 %vm2778_vm0, %v2777_v1 }
0x1097   :  { %2581 = vmatprep.subr.bf16.mxu0 %v2777_v1 }
0x109a   :  { %2582 = vmatpush3.bf16.msra.mxu0 %v1935_v3 }
0x109b   :  { %2587 = vmatprep.subr.bf16.mxu0 %v2777_v1 }
0x1168   :  { %v1901_v6 = vpop.f32.mrb[16].mxu0 }
0x1169   :  { %v1902_v8 = vadd.f32 %v2393_v4, %v1901_v6  ;;  %v2577_v10 = vpop.f32.mrb[17].mxu0 }
0x116a   :  { %v1904_v11 = vpop.f32.mrb[18].mxu0 }
0x116b   :  { %v1907_v13 = vmax.f32 %v1902_v8, 0.0  ;;  %v2578_v14 = vpop.f32.mrb[19].mxu0 }
0x116d   :  { %v1908_v17 = vpack.c.bf16 %v1907_v13, %v1907_v13 }
0x116f   :  { %2584 = vmatmul.mubr.msk.bf16.vlgmr.msra.gmra.mrb[20].mxu0 %vm397_vm2, %v1908_v17 }
0x1170   :  { %2588 = vmatpush3.bf16.msra.mxu0 %v2731_v16  ;;  %2603 = vmatprep.mubr.msk.bf16.mxu0 %vm2778_vm0, %v2777_v1 }
0x1171   :  { %2589 = vmatprep.subr.bf16.mxu0 %v2777_v1 }
0x1174   :  { %2590 = vmatpush3.bf16.msra.mxu0 %v2732_v19 }
0x1175   :  { %2591 = vmatprep.subr.bf16.mxu0 %v2777_v1 }
0x1178   :  { %2592 = vmatpush3.bf16.msra.mxu0 %v2733_v20 }
0x1179   :  { %2593 = vmatprep.subr.bf16.mxu0 %v2777_v1 }
0x117c   :  { %2594 = vmatpush3.bf16.msra.mxu0 %v2734_v56 }
0x117d   :  { %2595 = vmatprep.subr.bf16.mxu0 %v2777_v1 }
0x1180   :  { %2596 = vmatpush3.bf16.msra.mxu0 %v2735_v22 }
0x1181   :  { %2597 = vmatprep.subr.bf16.mxu0 %v2777_v1 }
0x1184   :  { %2598 = vmatpush3.bf16.msra.mxu0 %v2736_v24 }
0x1185   :  { %2599 = vmatprep.subr.bf16.mxu0 %v2777_v1 }
0x1188   :  { %2600 = vmatpush3.bf16.msra.mxu0 %v2737_v25 }
0x1189   :  { %2601 = vmatprep.subr.bf16.mxu0 %v2777_v1 }
0x118c   :  { %2602 = vmatpush3.bf16.msra.mxu0 %v2050_v30 }
0x1242   :  { %v1971_v36 = vpop.f32.mrb[20].mxu0 }
0x1243   :  { %v1972_v37 = vadd.f32 %v2397_v34, %v1971_v36  ;;  %v2585_v23 = vpop.f32.mrb[21].mxu0 }
0x1244   :  { %v1974_v39 = vpop.f32.mrb[22].mxu0 }
0x1245   :  { %v1977_v26 = vadd.f32 %v1972_v37, %v3453_v47  ;;  %v2586_v40 = vpop.f32.mrb[23].mxu0  ;;  %v2742_v47 = vld [vmem:[%s3605_s21 + $0x8] sm:$0x7f]  }
0x1246   :  { %v2190_v51 = vsel %vm401_vm1, %v2742_v47, 0 }
0x1247   :  { %v1978_v41 = vpack.c.bf16 %v1977_v26, %v1977_v26 }
0x1249   :  { %2604 = vmatmul.mubr.msk.bf16.vlgmr.msra.gmra.mrb[24].mxu0 %vm1719_vm8, %v1978_v41 }
0x131c   :  { %v2086_v43 = vpop.f32.mrb[24].mxu0 }
0x131d   :  { %v2087_v35 = vadd.f32 %v2401_v32, %v2086_v43  ;;  %v2605_v44 = vpop.f32.mrb[25].mxu0 }
0x131e   :  { %v2089_v38 = vpop.f32.mrb[26].mxu0 }
0x131f   :  { %v2092_v15 = vmax.f32 %v2087_v35, 0.0  ;;  %v2606_v45 = vpop.f32.mrb[27].mxu0 }
0x1321   :  { %v2093_v63 = vpack.c.bf16 %v2092_v15, %v2092_v15 }
0x1323   :  { %2612 = vmatmul.mubr.msk.bf16.vlgmr.msra.gmra.mrb[12].mxu1 %vm397_vm2, %v2093_v63 }
0x1324   :  { %2616 = vmatpush3.bf16.msra.mxu1 %v2741_v46  ;;  %2619 = vmatprep.mubr.msk.bf16.mxu1 %vm2778_vm0, %v2777_v1 }
0x1325   :  { %2617 = vmatprep.subr.bf16.mxu1 %v2777_v1 }
0x1328   :  { %2618 = vmatpush3.bf16.msra.mxu1 %v2190_v51 }
0x1329   :  { %2623 = vmatprep.subr.bf16.mxu1 %v2777_v1 }
0x13f6   :  { %v2156_v27 = vpop.f32.mrb[12].mxu1 }
0x13f7   :  { %v2157_v7 = vadd.f32 %v2411_v50, %v2156_v27  ;;  %v2613_v12 = vpop.f32.mrb[13].mxu1 }
0x13f8   :  { %v2159_v61 = vpop.f32.mrb[14].mxu1 }
0x13f9   :  { %v2162_v18 = vmax.f32 %v2157_v7, 0.0  ;;  %v2614_v48 = vpop.f32.mrb[15].mxu1 }
0x13fb   :  { %v2163_v9 = vpack.c.bf16 %v2162_v18, %v2162_v18 }
0x13fd   :  { %2620 = vmatmul.mubr.msk.bf16.vlgmr.msra.gmra.mrb[16].mxu1 %vm397_vm2, %v2163_v9 }
0x13fe   :  { %2624 = vmatpush3.bf16.msra.mxu1 %v2743_v31  ;;  %2627 = vmatprep.mubr.msk.bf16.mxu1 %vm2778_vm0, %v2777_v1 }
0x13ff   :  { %2625 = vmatprep.subr.bf16.mxu1 %v2777_v1  ;;  %v2419_v1 = vld [vmem:[%s3610_s24] ss:$0 sm:$0xff] }
0x1402   :  { %2626 = vmatpush3.bf16.msra.mxu1 %v2260_v54 }
0x14d0   :  { %v2226_v55 = vpop.f32.mrb[16].mxu1 }
0x14d1   :  { %v2227_v59 = vadd.f32 %v2415_v53, %v2226_v55  ;;  %v2621_v62 = vpop.f32.mrb[17].mxu1 }
0x14d2   :  { %v2229_v49 = vpop.f32.mrb[18].mxu1 }
0x14d3   :  { %v2232_v5 = vmax.f32 %v2227_v59, 0.0  ;;  %v2622_v21 = vpop.f32.mrb[19].mxu1 }
0x14d5   :  { %v2233_v52 = vpack.c.bf16 %v2232_v5, %v2232_v5 }
0x14d7   :  { %2628 = vmatmul.mubr.msk.bf16.vlgmr.msra.gmra.mrb[20].mxu1 %vm397_vm2, %v2233_v52 }
0x15aa   :  { %v2296_v57 = vpop.f32.mrb[20].mxu1 }
0x15ab   :  { %v2297_v58 = vadd.f32 %v2419_v1, %v2296_v57  ;;  %v2629_v60 = vpop.f32.mrb[21].mxu1 }
0x15ac   :  { %v2299_v2 = vpop.f32.mrb[22].mxu1 }
0x15ad   :  { %2302 = vst [vmem:[%s3611_s25] sm:$0xff] %v2297_v58  ;;  %v2630_v3 = vpop.f32.mrb[23].mxu1 }

</bundles_post_ra>
